<compile_context>
chip_gen: v5e
topology: v5e:2x2
jax: 0.10.0
libtpu: 0.0.40
codegen_flags: <defaults>
</compile_context>

<pallas_src>
import functools

import jax
import jax.numpy as jnp
from jax import lax
from jax.experimental import pallas as pl
from jax.experimental.pallas import tpu as pltpu


def _round_up(x, m):
    return ((x + m - 1) // m) * m


def _sigmoid(x):
    # exact rewrite of sigmoid: single tanh EUP push + cheap VPU fma (v5e-friendly)
    return 0.5 * jnp.tanh(0.5 * x) + 0.5


# ---------------------------------------------------------------------------
# Fused kernel: per (batch_tile, time_chunk) block
#   1) GI = X_chunk @ W_ih + b_i   -> VMEM scratch (one big MXU op, parallel work)
#   2) serial GRU recurrence over the chunk: one fused (Bt,HP)@(HP,3HP) MXU push per
#      timestep; hidden state carried across time blocks in a VMEM scratch.
# ---------------------------------------------------------------------------
def gru_fused_kernel(x_ref, w_ih_ref, b_i_ref, w_hh_ref, b_hn_ref,
                     hid_ref, h_state, gi_scratch, *, unroll):
    t_blk = pl.program_id(1)

    @pl.when(t_blk == 0)
    def _():
        h_state[...] = jnp.zeros_like(h_state)

    tc, bt, dp = x_ref.shape
    hp = h_state.shape[1]

    w_ih = w_ih_ref[...]                       # (DP, 3HP)  compute dtype (bf16/f32)
    w_hh = w_hh_ref[...]                       # (HP, 3HP)  compute dtype
    b_hn = b_hn_ref[...]                       # (1, HP)    f32

    # ---- chunk input projection (hoisted out of the serial chain) --------------------
    x2 = x_ref[...].reshape(tc * bt, dp).astype(w_ih.dtype)          # clean merge: bt % 8 == 0
    gi = jnp.dot(x2, w_ih, preferred_element_type=jnp.float32) + b_i_ref[...]
    gi_scratch[...] = gi.reshape(tc, bt, 3 * hp)

    # ---- serial recurrence ------------------------------------------------------------
    # TODO(synk): for very small B (Bt stuck near 8) keep W_hh resident across the chunk
    # with pltpu.matmul_push_rhs / matmul_acc_lhs / matmul_pop instead of re-pushing the
    # RHS every step.
    def step(t, h_prev):
        gi_t = gi_scratch[t]                                          # (Bt, 3HP) f32
        gh = jnp.dot(h_prev.astype(w_hh.dtype), w_hh,
                     preferred_element_type=jnp.float32)              # one fused MXU push
        r = _sigmoid(gi_t[:, :hp] + gh[:, :hp])
        z = _sigmoid(gi_t[:, hp:2 * hp] + gh[:, hp:2 * hp])
        n = jnp.tanh(gi_t[:, 2 * hp:] + r * (gh[:, 2 * hp:] + b_hn))
        h = (1.0 - z) * n + z * h_prev                                # f32 state
        hid_ref[t] = h
        return h

    h_state[...] = lax.fori_loop(0, tc, step, h_state[...], unroll=unroll)


# ---------------------------------------------------------------------------
# One-time parameter fusion / padding (torch per-gate layout -> fused matmul operands)
# ---------------------------------------------------------------------------
def fuse_gru_params(params, compute_dtype=jnp.bfloat16):
    """Returns w_ih (DP, 3HP), w_hh (HP, 3HP) in compute_dtype,
    b_i = [b_ir+b_hr, b_iz+b_hz, b_in] (1, 3HP) f32, b_hn (1, HP) f32.
    DP = round_up(D, 8) (sublane only), HP = round_up(H, 128) (lane)."""
    H, D = params["w_ir"].shape
    HP = _round_up(H, 128)
    DP = _round_up(D, 8)

    def pad_w(w, rows, cols):   # torch (H, in) -> transposed, zero-padded (rows, cols)
        wt = w.T
        return jnp.pad(wt, ((0, rows - wt.shape[0]), (0, cols - wt.shape[1])))

    def pad_b(b):
        return jnp.pad(b, (0, HP - b.shape[0]))

    w_ih = jnp.concatenate([pad_w(params["w_ir"], DP, HP),
                            pad_w(params["w_iz"], DP, HP),
                            pad_w(params["w_in"], DP, HP)], axis=1)      # (DP, 3HP)
    w_hh = jnp.concatenate([pad_w(params["w_hr"], HP, HP),
                            pad_w(params["w_hz"], HP, HP),
                            pad_w(params["w_hn"], HP, HP)], axis=1)      # (HP, 3HP)
    # fold the r/z hidden biases into the input bias; b_hn must stay inside r*(...)
    b_i = jnp.concatenate([pad_b(params["b_ir"] + params["b_hr"]),
                           pad_b(params["b_iz"] + params["b_hz"]),
                           pad_b(params["b_in"])])[None, :]              # (1, 3HP)
    b_hn = pad_b(params["b_hn"])[None, :]                                # (1, HP)

    return {"w_ih": w_ih.astype(compute_dtype),
            "w_hh": w_hh.astype(compute_dtype),
            "b_i": b_i.astype(jnp.float32),
            "b_hn": b_hn.astype(jnp.float32)}


# ---------------------------------------------------------------------------
# Wrapper
# ---------------------------------------------------------------------------
def gru_encoder_pallas(embedded, q_len, fused, *, dim_hidden,
                       time_chunk=32, batch_tile=None, unroll=8):
    """embedded: (T, B, D) f32; q_len: (B,) int32; fused: fuse_gru_params(...) output.
    Returns (hid (T, B, H), hidden_out (B, H)) with torch nn.GRU semantics (h0 = 0)."""
    T, B, D = embedded.shape
    H = dim_hidden
    DP = fused["w_ih"].shape[0]
    HP = fused["w_hh"].shape[0]
    G3 = 3 * HP

    # ---- tile selection: fill the MXU M-dim with batch when B permits (cap 256) ------
    if batch_tile is None:
        batch_tile = min(_round_up(B, 8), 256)
    batch_tile = max(8, _round_up(batch_tile, 8))
    BP = _round_up(B, batch_tile)
    tc = max(1, min(time_chunk, T))
    TP = _round_up(T, tc)
    nb, nt = BP // batch_tile, TP // tc
    unroll_eff = max(1, min(unroll, tc))

    x = jnp.pad(embedded, ((0, TP - T), (0, BP - B), (0, DP - D)))

    wbytes = jnp.dtype(fused["w_ih"].dtype).itemsize
    # double-buffered ins/outs + scratch, 2x headroom, capped below v7x's 64 MiB VMEM.
    vmem_need = (2 * tc * batch_tile * DP * 4            # x blocks
                 + 2 * tc * batch_tile * HP * 4          # hid blocks
                 + 2 * (DP + HP) * G3 * wbytes           # weights (double-buffered)
                 + 2 * (G3 + HP) * 4                     # biases
                 + tc * batch_tile * G3 * 4              # gi scratch
                 + batch_tile * HP * 4)                  # carried hidden state
    vmem_limit = int(min(max(2 * vmem_need, 32 * 1024 * 1024), 60 * 1024 * 1024))

    cost = pl.CostEstimate(
        flops=2 * TP * BP * G3 * (DP + HP) + 12 * TP * BP * HP,
        transcendentals=3 * TP * BP * HP,
        bytes_accessed=4 * TP * BP * (DP + HP) + wbytes * (DP + HP) * G3,
    )

    # TODO(synk): single-buffer the constant weight/bias blocks (pipeline_mode=pl.Buffered(1))
    # to free VMEM for even larger tiles once that path is needed; negligible at these sizes.
    hid_pad = pl.pallas_call(
        functools.partial(gru_fused_kernel, unroll=unroll_eff),
        out_shape=jax.ShapeDtypeStruct((TP, BP, HP), jnp.float32),
        grid_spec=pltpu.PrefetchScalarGridSpec(
            num_scalar_prefetch=0,
            grid=(nb, nt),
            in_specs=[
                pl.BlockSpec((tc, batch_tile, DP), lambda b, t: (t, b, 0)),
                pl.BlockSpec((DP, G3), lambda b, t: (0, 0)),
                pl.BlockSpec((1, G3), lambda b, t: (0, 0)),
                pl.BlockSpec((HP, G3), lambda b, t: (0, 0)),
                pl.BlockSpec((1, HP), lambda b, t: (0, 0)),
            ],
            out_specs=pl.BlockSpec((tc, batch_tile, HP), lambda b, t: (t, b, 0)),
            scratch_shapes=[
                pltpu.VMEM((batch_tile, HP), jnp.float32),       # hidden state (carried)
                pltpu.VMEM((tc, batch_tile, G3), jnp.float32),   # chunk GI
            ],
        ),
        compiler_params=pltpu.CompilerParams(
            dimension_semantics=("parallel", "arbitrary"),       # batch parallel, time serial
            vmem_limit_bytes=vmem_limit),
        cost_estimate=cost,
    )(x, fused["w_ih"], fused["b_i"], fused["w_hh"], fused["b_hn"])

    hid = hid_pad[:T, :B, :H]

    # hidden_out[i] = hid[q_len[i]-1, i]  (torch negative-index wrap for q_len == 0)
    last = q_len - 1
    last = jnp.where(last < 0, last + T, last)
    hidden_out = hid[last, jnp.arange(B)]
    return hid, hidden_out


gru_encoder_pallas = jax.jit(
    gru_encoder_pallas,
    static_argnames=("dim_hidden", "time_chunk", "batch_tile", "unroll"))


# ---------------------------------------------------------------------------
# Pure-JAX reference (torch.nn.GRU semantics, r/z/n gate order)
# ---------------------------------------------------------------------------
def gru_encoder_ref(embedded, q_len, params):
    def step(h, x_t):
        gi_r = x_t @ params["w_ir"].T + params["b_ir"]
        gi_z = x_t @ params["w_iz"].T + params["b_iz"]
        gi_n = x_t @ params["w_in"].T + params["b_in"]
        gh_r = h @ params["w_hr"].T + params["b_hr"]
        gh_z = h @ params["w_hz"].T + params["b_hz"]
        gh_n = h @ params["w_hn"].T + params["b_hn"]
        r = jax.nn.sigmoid(gi_r + gh_r)
        z = jax.nn.sigmoid(gi_z + gh_z)
        n = jnp.tanh(gi_n + r * gh_n)
        h_new = (1.0 - z) * n + z * h
        return h_new, h_new

    T, B, _ = embedded.shape
    H = params["w_hr"].shape[0]
    h0 = jnp.zeros((B, H), jnp.float32)
    _, hid = lax.scan(step, h0, embedded)
    hidden_out = hid[q_len - 1, jnp.arange(B)]
    return hid, hidden_out


def make_params(key, dim_word, dim_hidden):
    scale = 1.0 / jnp.sqrt(jnp.float32(dim_hidden))
    keys = jax.random.split(key, 12)
    u = lambda k, shape: jax.random.uniform(k, shape, jnp.float32, -scale, scale)
    return {
        "w_ir": u(keys[0], (dim_hidden, dim_word)),
        "w_iz": u(keys[1], (dim_hidden, dim_word)),
        "w_in": u(keys[2], (dim_hidden, dim_word)),
        "w_hr": u(keys[3], (dim_hidden, dim_hidden)),
        "w_hz": u(keys[4], (dim_hidden, dim_hidden)),
        "w_hn": u(keys[5], (dim_hidden, dim_hidden)),
        "b_ir": u(keys[6], (dim_hidden,)),
        "b_iz": u(keys[7], (dim_hidden,)),
        "b_in": u(keys[8], (dim_hidden,)),
        "b_hr": u(keys[9], (dim_hidden,)),
        "b_hz": u(keys[10], (dim_hidden,)),
        "b_hn": u(keys[11], (dim_hidden,)),
    }


if __name__ == "__main__":
    T, B, D_WORD, D_HIDDEN = 8, 2, 16, 32

    key = jax.random.PRNGKey(0)
    k_x, k_p = jax.random.split(key)
    embedded = jax.random.normal(k_x, (T, B, D_WORD), jnp.float32)
    q_len = jnp.array([T, T // 2], dtype=jnp.int32)
    params = make_params(k_p, D_WORD, D_HIDDEN)

    hid_r, hout_r = gru_encoder_ref(embedded, q_len, params)

    # f32 weights (tight check)
    fused_f32 = fuse_gru_params(params, compute_dtype=jnp.float32)
    hid, hidden_out = jax.block_until_ready(
        gru_encoder_pallas(embedded, q_len, fused_f32, dim_hidden=D_HIDDEN))
    assert hid.shape == (T, B, D_HIDDEN) and hidden_out.shape == (B, D_HIDDEN)
    assert jnp.allclose(hid, hid_r, rtol=1e-4, atol=1e-5)
    assert jnp.allclose(hidden_out, hout_r, rtol=1e-4, atol=1e-5)

    # default: bf16 matmul operands, f32 state/accumulation (loose check) — v6e/v7x path
    fused_bf16 = fuse_gru_params(params)
    hid_b, hout_b = jax.block_until_ready(
        gru_encoder_pallas(embedded, q_len, fused_bf16, dim_hidden=D_HIDDEN))
    assert jnp.allclose(hid_b, hid_r, rtol=5e-2, atol=5e-2)
    assert jnp.allclose(hout_b, hout_r, rtol=5e-2, atol=5e-2)

    print("KERNEL_OK")
</pallas_src>

<mosaic_0001>
module attributes {stable_mosaic.version = 11 : i64} {
  func.func @gru_fused_kernel(%arg0: i32, %arg1: i32, %arg2: memref<8x8x16xf32, #tpu.memory_space<vmem>>, %arg3: memref<16x384xf32, #tpu.memory_space<vmem>>, %arg4: memref<1x384xf32, #tpu.memory_space<vmem>>, %arg5: memref<128x384xf32, #tpu.memory_space<vmem>>, %arg6: memref<1x128xf32, #tpu.memory_space<vmem>>, %arg7: memref<8x8x128xf32, #tpu.memory_space<vmem>>, %arg8: memref<8x128xf32, #tpu.memory_space<vmem>>, %arg9: memref<8x8x384xf32, #tpu.memory_space<vmem>>) attributes {dimension_semantics = [#tpu.dimension_semantics<parallel>, #tpu.dimension_semantics<arbitrary>], iteration_bounds = array<i64: 1, 1>, scalar_prefetch = 0 : i64, scratch_operands = 2 : i64, tpu.core_type = #tpu.core_type<tc>, window_params = [{transform_indices = @transform_0, window_bounds = array<i64: 8, 8, 16>}, {pipeline_mode = #tpu.pipeline_mode<synchronous>, transform_indices = @transform_1, window_bounds = array<i64: 16, 384>}, {pipeline_mode = #tpu.pipeline_mode<synchronous>, transform_indices = @transform_2, window_bounds = array<i64: 1, 384>}, {pipeline_mode = #tpu.pipeline_mode<synchronous>, transform_indices = @transform_3, window_bounds = array<i64: 128, 384>}, {pipeline_mode = #tpu.pipeline_mode<synchronous>, transform_indices = @transform_4, window_bounds = array<i64: 1, 128>}, {transform_indices = @transform_5, window_bounds = array<i64: 8, 8, 128>}]} {
    %c0_i32 = arith.constant 0 : i32
    %0 = arith.cmpi eq, %arg1, %c0_i32 : i32
    %1 = arith.extui %0 : i1 to i32
    %c0_i32_0 = arith.constant 0 : i32
    %2 = arith.cmpi ne, %1, %c0_i32_0 : i32
    scf.if %2 {
      %cst_115 = arith.constant 0.000000e+00 : f32
      %336 = vector.broadcast %cst_115 : f32 to vector<8x128xf32>
      %c0_116 = arith.constant 0 : index
      %c0_117 = arith.constant 0 : index
      %337 = vector.load %arg8[%c0_116, %c0_117] : memref<8x128xf32, #tpu.memory_space<vmem>>, vector<8x128xf32>
      tpu.vector_store %arg8[%c0_116, %c0_117], %336 {strides = array<i32>} : memref<8x128xf32, #tpu.memory_space<vmem>>, vector<8x128xf32>,
    } else {
    }
    %c0 = arith.constant 0 : index
    %c0_1 = arith.constant 0 : index
    %3 = vector.load %arg3[%c0, %c0_1] : memref<16x384xf32, #tpu.memory_space<vmem>>, vector<16x384xf32>
    %c0_2 = arith.constant 0 : index
    %c0_3 = arith.constant 0 : index
    %4 = vector.load %arg5[%c0_2, %c0_3] : memref<128x384xf32, #tpu.memory_space<vmem>>, vector<128x384xf32>
    %c0_4 = arith.constant 0 : index
    %c0_5 = arith.constant 0 : index
    %5 = vector.load %arg6[%c0_4, %c0_5] : memref<1x128xf32, #tpu.memory_space<vmem>>, vector<1x128xf32>
    %c0_6 = arith.constant 0 : index
    %c0_7 = arith.constant 0 : index
    %c0_8 = arith.constant 0 : index
    %6 = vector.load %arg2[%c0_6, %c0_7, %c0_8] : memref<8x8x16xf32, #tpu.memory_space<vmem>>, vector<8x8x16xf32>
    %7 = vector.shape_cast %6 : vector<8x8x16xf32> to vector<64x16xf32>
    %cst = arith.constant dense<0.000000e+00> : vector<64x384xf32>
    %8 = tpu.matmul %7, %3, %cst {dimension_numbers = #tpu.dot_dimension_numbers<[1], [0], [0], [1], [0, 0, 1, 1], [], []>} : vector<64x16xf32>, vector<16x384xf32>, vector<64x384xf32> -> vector<64x384xf32>
    %c0_9 = arith.constant 0 : index
    %c0_10 = arith.constant 0 : index
    %9 = vector.load %arg4[%c0_9, %c0_10] : memref<1x384xf32, #tpu.memory_space<vmem>>, vector<1x384xf32>
    %10 = vector.broadcast %9 : vector<1x384xf32> to vector<64x384xf32>
    %11 = arith.addf %8, %10 : vector<64x384xf32>
    %12 = vector.shape_cast %11 : vector<64x384xf32> to vector<8x8x384xf32>
    %c0_11 = arith.constant 0 : index
    %c0_12 = arith.constant 0 : index
    %c0_13 = arith.constant 0 : index
    %13 = vector.load %arg9[%c0_11, %c0_12, %c0_13] : memref<8x8x384xf32, #tpu.memory_space<vmem>>, vector<8x8x384xf32>
    tpu.vector_store %arg9[%c0_11, %c0_12, %c0_13], %12 {strides = array<i32>} : memref<8x8x384xf32, #tpu.memory_space<vmem>>, vector<8x8x384xf32>,
    %c0_14 = arith.constant 0 : index
    %c0_15 = arith.constant 0 : index
    %14 = vector.load %arg8[%c0_14, %c0_15] : memref<8x128xf32, #tpu.memory_space<vmem>>, vector<8x128xf32>
    %c0_i32_16 = arith.constant 0 : i32
    %15 = arith.index_cast %c0_i32_16 : i32 to index
    %c0_17 = arith.constant 0 : index
    %c0_18 = arith.constant 0 : index
    %16 = vector.load %arg9[%15, %c0_17, %c0_18] : memref<8x8x384xf32, #tpu.memory_space<vmem>>, vector<1x8x384xf32>
    %17 = vector.shape_cast %16 : vector<1x8x384xf32> to vector<8x384xf32>
    %cst_19 = arith.constant dense<0.000000e+00> : vector<8x384xf32>
    %18 = tpu.matmul %14, %4, %cst_19 {dimension_numbers = #tpu.dot_dimension_numbers<[1], [0], [0], [1], [0, 0, 1, 1], [], []>} : vector<8x128xf32>, vector<128x384xf32>, vector<8x384xf32> -> vector<8x384xf32>
    %19 = vector.extract_strided_slice %17 {offsets = [0, 0], sizes = [8, 128], strides = [1, 1]} : vector<8x384xf32> to vector<8x128xf32>
    %20 = vector.extract_strided_slice %18 {offsets = [0, 0], sizes = [8, 128], strides = [1, 1]} : vector<8x384xf32> to vector<8x128xf32>
    %21 = arith.addf %19, %20 : vector<8x128xf32>
    %cst_20 = arith.constant 5.000000e-01 : f32
    %22 = vector.broadcast %cst_20 : f32 to vector<8x128xf32>
    %23 = arith.mulf %22, %21 : vector<8x128xf32>
    %24 = math.tanh %23 : vector<8x128xf32>
    %cst_21 = arith.constant 5.000000e-01 : f32
    %25 = vector.broadcast %cst_21 : f32 to vector<8x128xf32>
    %26 = arith.mulf %25, %24 : vector<8x128xf32>
    %cst_22 = arith.constant 5.000000e-01 : f32
    %27 = vector.broadcast %cst_22 : f32 to vector<8x128xf32>
    %28 = arith.addf %26, %27 : vector<8x128xf32>
    %29 = vector.extract_strided_slice %17 {offsets = [0, 128], sizes = [8, 128], strides = [1, 1]} : vector<8x384xf32> to vector<8x128xf32>
    %30 = vector.extract_strided_slice %18 {offsets = [0, 128], sizes = [8, 128], strides = [1, 1]} : vector<8x384xf32> to vector<8x128xf32>
    %31 = arith.addf %29, %30 : vector<8x128xf32>
    %cst_23 = arith.constant 5.000000e-01 : f32
    %32 = vector.broadcast %cst_23 : f32 to vector<8x128xf32>
    %33 = arith.mulf %32, %31 : vector<8x128xf32>
    %34 = math.tanh %33 : vector<8x128xf32>
    %cst_24 = arith.constant 5.000000e-01 : f32
    %35 = vector.broadcast %cst_24 : f32 to vector<8x128xf32>
    %36 = arith.mulf %35, %34 : vector<8x128xf32>
    %cst_25 = arith.constant 5.000000e-01 : f32
    %37 = vector.broadcast %cst_25 : f32 to vector<8x128xf32>
    %38 = arith.addf %36, %37 : vector<8x128xf32>
    %39 = vector.extract_strided_slice %17 {offsets = [0, 256], sizes = [8, 128], strides = [1, 1]} : vector<8x384xf32> to vector<8x128xf32>
    %40 = vector.extract_strided_slice %18 {offsets = [0, 256], sizes = [8, 128], strides = [1, 1]} : vector<8x384xf32> to vector<8x128xf32>
    %41 = vector.broadcast %5 : vector<1x128xf32> to vector<8x128xf32>
    %42 = arith.addf %40, %41 : vector<8x128xf32>
    %43 = arith.mulf %28, %42 : vector<8x128xf32>
    %44 = arith.addf %39, %43 : vector<8x128xf32>
    %45 = math.tanh %44 : vector<8x128xf32>
    %cst_26 = arith.constant 1.000000e+00 : f32
    %46 = vector.broadcast %cst_26 : f32 to vector<8x128xf32>
    %47 = arith.subf %46, %38 : vector<8x128xf32>
    %48 = arith.mulf %47, %45 : vector<8x128xf32>
    %49 = arith.mulf %38, %14 : vector<8x128xf32>
    %50 = arith.addf %48, %49 : vector<8x128xf32>
    %51 = arith.index_cast %c0_i32_16 : i32 to index
    %c0_27 = arith.constant 0 : index
    %c0_28 = arith.constant 0 : index
    %52 = vector.load %arg7[%51, %c0_27, %c0_28] : memref<8x8x128xf32, #tpu.memory_space<vmem>>, vector<1x8x128xf32>
    %53 = vector.shape_cast %52 : vector<1x8x128xf32> to vector<8x128xf32>
    %54 = vector.shape_cast %50 : vector<8x128xf32> to vector<1x8x128xf32>
    tpu.vector_store %arg7[%51, %c0_27, %c0_28], %54 {strides = array<i32>} : memref<8x8x128xf32, #tpu.memory_space<vmem>>, vector<1x8x128xf32>,
    %c1_i32 = arith.constant 1 : i32
    %55 = arith.index_cast %c1_i32 : i32 to index
    %c0_29 = arith.constant 0 : index
    %c0_30 = arith.constant 0 : index
    %56 = vector.load %arg9[%55, %c0_29, %c0_30] : memref<8x8x384xf32, #tpu.memory_space<vmem>>, vector<1x8x384xf32>
    %57 = vector.shape_cast %56 : vector<1x8x384xf32> to vector<8x384xf32>
    %cst_31 = arith.constant dense<0.000000e+00> : vector<8x384xf32>
    %58 = tpu.matmul %50, %4, %cst_31 {dimension_numbers = #tpu.dot_dimension_numbers<[1], [0], [0], [1], [0, 0, 1, 1], [], []>} : vector<8x128xf32>, vector<128x384xf32>, vector<8x384xf32> -> vector<8x384xf32>
    %59 = vector.extract_strided_slice %57 {offsets = [0, 0], sizes = [8, 128], strides = [1, 1]} : vector<8x384xf32> to vector<8x128xf32>
    %60 = vector.extract_strided_slice %58 {offsets = [0, 0], sizes = [8, 128], strides = [1, 1]} : vector<8x384xf32> to vector<8x128xf32>
    %61 = arith.addf %59, %60 : vector<8x128xf32>
    %cst_32 = arith.constant 5.000000e-01 : f32
    %62 = vector.broadcast %cst_32 : f32 to vector<8x128xf32>
    %63 = arith.mulf %62, %61 : vector<8x128xf32>
    %64 = math.tanh %63 : vector<8x128xf32>
    %cst_33 = arith.constant 5.000000e-01 : f32
    %65 = vector.broadcast %cst_33 : f32 to vector<8x128xf32>
    %66 = arith.mulf %65, %64 : vector<8x128xf32>
    %cst_34 = arith.constant 5.000000e-01 : f32
    %67 = vector.broadcast %cst_34 : f32 to vector<8x128xf32>
    %68 = arith.addf %66, %67 : vector<8x128xf32>
    %69 = vector.extract_strided_slice %57 {offsets = [0, 128], sizes = [8, 128], strides = [1, 1]} : vector<8x384xf32> to vector<8x128xf32>
    %70 = vector.extract_strided_slice %58 {offsets = [0, 128], sizes = [8, 128], strides = [1, 1]} : vector<8x384xf32> to vector<8x128xf32>
    %71 = arith.addf %69, %70 : vector<8x128xf32>
    %cst_35 = arith.constant 5.000000e-01 : f32
    %72 = vector.broadcast %cst_35 : f32 to vector<8x128xf32>
    %73 = arith.mulf %72, %71 : vector<8x128xf32>
    %74 = math.tanh %73 : vector<8x128xf32>
    %cst_36 = arith.constant 5.000000e-01 : f32
    %75 = vector.broadcast %cst_36 : f32 to vector<8x128xf32>
    %76 = arith.mulf %75, %74 : vector<8x128xf32>
    %cst_37 = arith.constant 5.000000e-01 : f32
    %77 = vector.broadcast %cst_37 : f32 to vector<8x128xf32>
    %78 = arith.addf %76, %77 : vector<8x128xf32>
    %79 = vector.extract_strided_slice %57 {offsets = [0, 256], sizes = [8, 128], strides = [1, 1]} : vector<8x384xf32> to vector<8x128xf32>
    %80 = vector.extract_strided_slice %58 {offsets = [0, 256], sizes = [8, 128], strides = [1, 1]} : vector<8x384xf32> to vector<8x128xf32>
    %81 = vector.broadcast %5 : vector<1x128xf32> to vector<8x128xf32>
    %82 = arith.addf %80, %81 : vector<8x128xf32>
    %83 = arith.mulf %68, %82 : vector<8x128xf32>
    %84 = arith.addf %79, %83 : vector<8x128xf32>
    %85 = math.tanh %84 : vector<8x128xf32>
    %cst_38 = arith.constant 1.000000e+00 : f32
    %86 = vector.broadcast %cst_38 : f32 to vector<8x128xf32>
    %87 = arith.subf %86, %78 : vector<8x128xf32>
    %88 = arith.mulf %87, %85 : vector<8x128xf32>
    %89 = arith.mulf %78, %50 : vector<8x128xf32>
    %90 = arith.addf %88, %89 : vector<8x128xf32>
    %91 = arith.index_cast %c1_i32 : i32 to index
    %c0_39 = arith.constant 0 : index
    %c0_40 = arith.constant 0 : index
    %92 = vector.load %arg7[%91, %c0_39, %c0_40] : memref<8x8x128xf32, #tpu.memory_space<vmem>>, vector<1x8x128xf32>
    %93 = vector.shape_cast %92 : vector<1x8x128xf32> to vector<8x128xf32>
    %94 = vector.shape_cast %90 : vector<8x128xf32> to vector<1x8x128xf32>
    tpu.vector_store %arg7[%91, %c0_39, %c0_40], %94 {strides = array<i32>} : memref<8x8x128xf32, #tpu.memory_space<vmem>>, vector<1x8x128xf32>,
    %c2_i32 = arith.constant 2 : i32
    %95 = arith.index_cast %c2_i32 : i32 to index
    %c0_41 = arith.constant 0 : index
    %c0_42 = arith.constant 0 : index
    %96 = vector.load %arg9[%95, %c0_41, %c0_42] : memref<8x8x384xf32, #tpu.memory_space<vmem>>, vector<1x8x384xf32>
    %97 = vector.shape_cast %96 : vector<1x8x384xf32> to vector<8x384xf32>
    %cst_43 = arith.constant dense<0.000000e+00> : vector<8x384xf32>
    %98 = tpu.matmul %90, %4, %cst_43 {dimension_numbers = #tpu.dot_dimension_numbers<[1], [0], [0], [1], [0, 0, 1, 1], [], []>} : vector<8x128xf32>, vector<128x384xf32>, vector<8x384xf32> -> vector<8x384xf32>
    %99 = vector.extract_strided_slice %97 {offsets = [0, 0], sizes = [8, 128], strides = [1, 1]} : vector<8x384xf32> to vector<8x128xf32>
    %100 = vector.extract_strided_slice %98 {offsets = [0, 0], sizes = [8, 128], strides = [1, 1]} : vector<8x384xf32> to vector<8x128xf32>
    %101 = arith.addf %99, %100 : vector<8x128xf32>
    %cst_44 = arith.constant 5.000000e-01 : f32
    %102 = vector.broadcast %cst_44 : f32 to vector<8x128xf32>
    %103 = arith.mulf %102, %101 : vector<8x128xf32>
    %104 = math.tanh %103 : vector<8x128xf32>
    %cst_45 = arith.constant 5.000000e-01 : f32
    %105 = vector.broadcast %cst_45 : f32 to vector<8x128xf32>
    %106 = arith.mulf %105, %104 : vector<8x128xf32>
    %cst_46 = arith.constant 5.000000e-01 : f32
    %107 = vector.broadcast %cst_46 : f32 to vector<8x128xf32>
    %108 = arith.addf %106, %107 : vector<8x128xf32>
    %109 = vector.extract_strided_slice %97 {offsets = [0, 128], sizes = [8, 128], strides = [1, 1]} : vector<8x384xf32> to vector<8x128xf32>
    %110 = vector.extract_strided_slice %98 {offsets = [0, 128], sizes = [8, 128], strides = [1, 1]} : vector<8x384xf32> to vector<8x128xf32>
    %111 = arith.addf %109, %110 : vector<8x128xf32>
    %cst_47 = arith.constant 5.000000e-01 : f32
    %112 = vector.broadcast %cst_47 : f32 to vector<8x128xf32>
    %113 = arith.mulf %112, %111 : vector<8x128xf32>
    %114 = math.tanh %113 : vector<8x128xf32>
    %cst_48 = arith.constant 5.000000e-01 : f32
    %115 = vector.broadcast %cst_48 : f32 to vector<8x128xf32>
    %116 = arith.mulf %115, %114 : vector<8x128xf32>
    %cst_49 = arith.constant 5.000000e-01 : f32
    %117 = vector.broadcast %cst_49 : f32 to vector<8x128xf32>
    %118 = arith.addf %116, %117 : vector<8x128xf32>
    %119 = vector.extract_strided_slice %97 {offsets = [0, 256], sizes = [8, 128], strides = [1, 1]} : vector<8x384xf32> to vector<8x128xf32>
    %120 = vector.extract_strided_slice %98 {offsets = [0, 256], sizes = [8, 128], strides = [1, 1]} : vector<8x384xf32> to vector<8x128xf32>
    %121 = vector.broadcast %5 : vector<1x128xf32> to vector<8x128xf32>
    %122 = arith.addf %120, %121 : vector<8x128xf32>
    %123 = arith.mulf %108, %122 : vector<8x128xf32>
    %124 = arith.addf %119, %123 : vector<8x128xf32>
    %125 = math.tanh %124 : vector<8x128xf32>
    %cst_50 = arith.constant 1.000000e+00 : f32
    %126 = vector.broadcast %cst_50 : f32 to vector<8x128xf32>
    %127 = arith.subf %126, %118 : vector<8x128xf32>
    %128 = arith.mulf %127, %125 : vector<8x128xf32>
    %129 = arith.mulf %118, %90 : vector<8x128xf32>
    %130 = arith.addf %128, %129 : vector<8x128xf32>
    %131 = arith.index_cast %c2_i32 : i32 to index
    %c0_51 = arith.constant 0 : index
    %c0_52 = arith.constant 0 : index
    %132 = vector.load %arg7[%131, %c0_51, %c0_52] : memref<8x8x128xf32, #tpu.memory_space<vmem>>, vector<1x8x128xf32>
    %133 = vector.shape_cast %132 : vector<1x8x128xf32> to vector<8x128xf32>
    %134 = vector.shape_cast %130 : vector<8x128xf32> to vector<1x8x128xf32>
    tpu.vector_store %arg7[%131, %c0_51, %c0_52], %134 {strides = array<i32>} : memref<8x8x128xf32, #tpu.memory_space<vmem>>, vector<1x8x128xf32>,
    %c3_i32 = arith.constant 3 : i32
    %135 = arith.index_cast %c3_i32 : i32 to index
    %c0_53 = arith.constant 0 : index
    %c0_54 = arith.constant 0 : index
    %136 = vector.load %arg9[%135, %c0_53, %c0_54] : memref<8x8x384xf32, #tpu.memory_space<vmem>>, vector<1x8x384xf32>
    %137 = vector.shape_cast %136 : vector<1x8x384xf32> to vector<8x384xf32>
    %cst_55 = arith.constant dense<0.000000e+00> : vector<8x384xf32>
    %138 = tpu.matmul %130, %4, %cst_55 {dimension_numbers = #tpu.dot_dimension_numbers<[1], [0], [0], [1], [0, 0, 1, 1], [], []>} : vector<8x128xf32>, vector<128x384xf32>, vector<8x384xf32> -> vector<8x384xf32>
    %139 = vector.extract_strided_slice %137 {offsets = [0, 0], sizes = [8, 128], strides = [1, 1]} : vector<8x384xf32> to vector<8x128xf32>
    %140 = vector.extract_strided_slice %138 {offsets = [0, 0], sizes = [8, 128], strides = [1, 1]} : vector<8x384xf32> to vector<8x128xf32>
    %141 = arith.addf %139, %140 : vector<8x128xf32>
    %cst_56 = arith.constant 5.000000e-01 : f32
    %142 = vector.broadcast %cst_56 : f32 to vector<8x128xf32>
    %143 = arith.mulf %142, %141 : vector<8x128xf32>
    %144 = math.tanh %143 : vector<8x128xf32>
    %cst_57 = arith.constant 5.000000e-01 : f32
    %145 = vector.broadcast %cst_57 : f32 to vector<8x128xf32>
    %146 = arith.mulf %145, %144 : vector<8x128xf32>
    %cst_58 = arith.constant 5.000000e-01 : f32
    %147 = vector.broadcast %cst_58 : f32 to vector<8x128xf32>
    %148 = arith.addf %146, %147 : vector<8x128xf32>
    %149 = vector.extract_strided_slice %137 {offsets = [0, 128], sizes = [8, 128], strides = [1, 1]} : vector<8x384xf32> to vector<8x128xf32>
    %150 = vector.extract_strided_slice %138 {offsets = [0, 128], sizes = [8, 128], strides = [1, 1]} : vector<8x384xf32> to vector<8x128xf32>
    %151 = arith.addf %149, %150 : vector<8x128xf32>
    %cst_59 = arith.constant 5.000000e-01 : f32
    %152 = vector.broadcast %cst_59 : f32 to vector<8x128xf32>
    %153 = arith.mulf %152, %151 : vector<8x128xf32>
    %154 = math.tanh %153 : vector<8x128xf32>
    %cst_60 = arith.constant 5.000000e-01 : f32
    %155 = vector.broadcast %cst_60 : f32 to vector<8x128xf32>
    %156 = arith.mulf %155, %154 : vector<8x128xf32>
    %cst_61 = arith.constant 5.000000e-01 : f32
    %157 = vector.broadcast %cst_61 : f32 to vector<8x128xf32>
    %158 = arith.addf %156, %157 : vector<8x128xf32>
    %159 = vector.extract_strided_slice %137 {offsets = [0, 256], sizes = [8, 128], strides = [1, 1]} : vector<8x384xf32> to vector<8x128xf32>
    %160 = vector.extract_strided_slice %138 {offsets = [0, 256], sizes = [8, 128], strides = [1, 1]} : vector<8x384xf32> to vector<8x128xf32>
    %161 = vector.broadcast %5 : vector<1x128xf32> to vector<8x128xf32>
    %162 = arith.addf %160, %161 : vector<8x128xf32>
    %163 = arith.mulf %148, %162 : vector<8x128xf32>
    %164 = arith.addf %159, %163 : vector<8x128xf32>
    %165 = math.tanh %164 : vector<8x128xf32>
    %cst_62 = arith.constant 1.000000e+00 : f32
    %166 = vector.broadcast %cst_62 : f32 to vector<8x128xf32>
    %167 = arith.subf %166, %158 : vector<8x128xf32>
    %168 = arith.mulf %167, %165 : vector<8x128xf32>
    %169 = arith.mulf %158, %130 : vector<8x128xf32>
    %170 = arith.addf %168, %169 : vector<8x128xf32>
    %171 = arith.index_cast %c3_i32 : i32 to index
    %c0_63 = arith.constant 0 : index
    %c0_64 = arith.constant 0 : index
    %172 = vector.load %arg7[%171, %c0_63, %c0_64] : memref<8x8x128xf32, #tpu.memory_space<vmem>>, vector<1x8x128xf32>
    %173 = vector.shape_cast %172 : vector<1x8x128xf32> to vector<8x128xf32>
    %174 = vector.shape_cast %170 : vector<8x128xf32> to vector<1x8x128xf32>
    tpu.vector_store %arg7[%171, %c0_63, %c0_64], %174 {strides = array<i32>} : memref<8x8x128xf32, #tpu.memory_space<vmem>>, vector<1x8x128xf32>,
    %c4_i32 = arith.constant 4 : i32
    %175 = arith.index_cast %c4_i32 : i32 to index
    %c0_65 = arith.constant 0 : index
    %c0_66 = arith.constant 0 : index
    %176 = vector.load %arg9[%175, %c0_65, %c0_66] : memref<8x8x384xf32, #tpu.memory_space<vmem>>, vector<1x8x384xf32>
    %177 = vector.shape_cast %176 : vector<1x8x384xf32> to vector<8x384xf32>
    %cst_67 = arith.constant dense<0.000000e+00> : vector<8x384xf32>
    %178 = tpu.matmul %170, %4, %cst_67 {dimension_numbers = #tpu.dot_dimension_numbers<[1], [0], [0], [1], [0, 0, 1, 1], [], []>} : vector<8x128xf32>, vector<128x384xf32>, vector<8x384xf32> -> vector<8x384xf32>
    %179 = vector.extract_strided_slice %177 {offsets = [0, 0], sizes = [8, 128], strides = [1, 1]} : vector<8x384xf32> to vector<8x128xf32>
    %180 = vector.extract_strided_slice %178 {offsets = [0, 0], sizes = [8, 128], strides = [1, 1]} : vector<8x384xf32> to vector<8x128xf32>
    %181 = arith.addf %179, %180 : vector<8x128xf32>
    %cst_68 = arith.constant 5.000000e-01 : f32
    %182 = vector.broadcast %cst_68 : f32 to vector<8x128xf32>
    %183 = arith.mulf %182, %181 : vector<8x128xf32>
    %184 = math.tanh %183 : vector<8x128xf32>
    %cst_69 = arith.constant 5.000000e-01 : f32
    %185 = vector.broadcast %cst_69 : f32 to vector<8x128xf32>
    %186 = arith.mulf %185, %184 : vector<8x128xf32>
    %cst_70 = arith.constant 5.000000e-01 : f32
    %187 = vector.broadcast %cst_70 : f32 to vector<8x128xf32>
    %188 = arith.addf %186, %187 : vector<8x128xf32>
    %189 = vector.extract_strided_slice %177 {offsets = [0, 128], sizes = [8, 128], strides = [1, 1]} : vector<8x384xf32> to vector<8x128xf32>
    %190 = vector.extract_strided_slice %178 {offsets = [0, 128], sizes = [8, 128], strides = [1, 1]} : vector<8x384xf32> to vector<8x128xf32>
    %191 = arith.addf %189, %190 : vector<8x128xf32>
    %cst_71 = arith.constant 5.000000e-01 : f32
    %192 = vector.broadcast %cst_71 : f32 to vector<8x128xf32>
    %193 = arith.mulf %192, %191 : vector<8x128xf32>
    %194 = math.tanh %193 : vector<8x128xf32>
    %cst_72 = arith.constant 5.000000e-01 : f32
    %195 = vector.broadcast %cst_72 : f32 to vector<8x128xf32>
    %196 = arith.mulf %195, %194 : vector<8x128xf32>
    %cst_73 = arith.constant 5.000000e-01 : f32
    %197 = vector.broadcast %cst_73 : f32 to vector<8x128xf32>
    %198 = arith.addf %196, %197 : vector<8x128xf32>
    %199 = vector.extract_strided_slice %177 {offsets = [0, 256], sizes = [8, 128], strides = [1, 1]} : vector<8x384xf32> to vector<8x128xf32>
    %200 = vector.extract_strided_slice %178 {offsets = [0, 256], sizes = [8, 128], strides = [1, 1]} : vector<8x384xf32> to vector<8x128xf32>
    %201 = vector.broadcast %5 : vector<1x128xf32> to vector<8x128xf32>
    %202 = arith.addf %200, %201 : vector<8x128xf32>
    %203 = arith.mulf %188, %202 : vector<8x128xf32>
    %204 = arith.addf %199, %203 : vector<8x128xf32>
    %205 = math.tanh %204 : vector<8x128xf32>
    %cst_74 = arith.constant 1.000000e+00 : f32
    %206 = vector.broadcast %cst_74 : f32 to vector<8x128xf32>
    %207 = arith.subf %206, %198 : vector<8x128xf32>
    %208 = arith.mulf %207, %205 : vector<8x128xf32>
    %209 = arith.mulf %198, %170 : vector<8x128xf32>
    %210 = arith.addf %208, %209 : vector<8x128xf32>
    %211 = arith.index_cast %c4_i32 : i32 to index
    %c0_75 = arith.constant 0 : index
    %c0_76 = arith.constant 0 : index
    %212 = vector.load %arg7[%211, %c0_75, %c0_76] : memref<8x8x128xf32, #tpu.memory_space<vmem>>, vector<1x8x128xf32>
    %213 = vector.shape_cast %212 : vector<1x8x128xf32> to vector<8x128xf32>
    %214 = vector.shape_cast %210 : vector<8x128xf32> to vector<1x8x128xf32>
    tpu.vector_store %arg7[%211, %c0_75, %c0_76], %214 {strides = array<i32>} : memref<8x8x128xf32, #tpu.memory_space<vmem>>, vector<1x8x128xf32>,
    %c5_i32 = arith.constant 5 : i32
    %215 = arith.index_cast %c5_i32 : i32 to index
    %c0_77 = arith.constant 0 : index
    %c0_78 = arith.constant 0 : index
    %216 = vector.load %arg9[%215, %c0_77, %c0_78] : memref<8x8x384xf32, #tpu.memory_space<vmem>>, vector<1x8x384xf32>
    %217 = vector.shape_cast %216 : vector<1x8x384xf32> to vector<8x384xf32>
    %cst_79 = arith.constant dense<0.000000e+00> : vector<8x384xf32>
    %218 = tpu.matmul %210, %4, %cst_79 {dimension_numbers = #tpu.dot_dimension_numbers<[1], [0], [0], [1], [0, 0, 1, 1], [], []>} : vector<8x128xf32>, vector<128x384xf32>, vector<8x384xf32> -> vector<8x384xf32>
    %219 = vector.extract_strided_slice %217 {offsets = [0, 0], sizes = [8, 128], strides = [1, 1]} : vector<8x384xf32> to vector<8x128xf32>
    %220 = vector.extract_strided_slice %218 {offsets = [0, 0], sizes = [8, 128], strides = [1, 1]} : vector<8x384xf32> to vector<8x128xf32>
    %221 = arith.addf %219, %220 : vector<8x128xf32>
    %cst_80 = arith.constant 5.000000e-01 : f32
    %222 = vector.broadcast %cst_80 : f32 to vector<8x128xf32>
    %223 = arith.mulf %222, %221 : vector<8x128xf32>
    %224 = math.tanh %223 : vector<8x128xf32>
    %cst_81 = arith.constant 5.000000e-01 : f32
    %225 = vector.broadcast %cst_81 : f32 to vector<8x128xf32>
    %226 = arith.mulf %225, %224 : vector<8x128xf32>
    %cst_82 = arith.constant 5.000000e-01 : f32
    %227 = vector.broadcast %cst_82 : f32 to vector<8x128xf32>
    %228 = arith.addf %226, %227 : vector<8x128xf32>
    %229 = vector.extract_strided_slice %217 {offsets = [0, 128], sizes = [8, 128], strides = [1, 1]} : vector<8x384xf32> to vector<8x128xf32>
    %230 = vector.extract_strided_slice %218 {offsets = [0, 128], sizes = [8, 128], strides = [1, 1]} : vector<8x384xf32> to vector<8x128xf32>
    %231 = arith.addf %229, %230 : vector<8x128xf32>
    %cst_83 = arith.constant 5.000000e-01 : f32
    %232 = vector.broadcast %cst_83 : f32 to vector<8x128xf32>
    %233 = arith.mulf %232, %231 : vector<8x128xf32>
    %234 = math.tanh %233 : vector<8x128xf32>
    %cst_84 = arith.constant 5.000000e-01 : f32
    %235 = vector.broadcast %cst_84 : f32 to vector<8x128xf32>
    %236 = arith.mulf %235, %234 : vector<8x128xf32>
    %cst_85 = arith.constant 5.000000e-01 : f32
    %237 = vector.broadcast %cst_85 : f32 to vector<8x128xf32>
    %238 = arith.addf %236, %237 : vector<8x128xf32>
    %239 = vector.extract_strided_slice %217 {offsets = [0, 256], sizes = [8, 128], strides = [1, 1]} : vector<8x384xf32> to vector<8x128xf32>
    %240 = vector.extract_strided_slice %218 {offsets = [0, 256], sizes = [8, 128], strides = [1, 1]} : vector<8x384xf32> to vector<8x128xf32>
    %241 = vector.broadcast %5 : vector<1x128xf32> to vector<8x128xf32>
    %242 = arith.addf %240, %241 : vector<8x128xf32>
    %243 = arith.mulf %228, %242 : vector<8x128xf32>
    %244 = arith.addf %239, %243 : vector<8x128xf32>
    %245 = math.tanh %244 : vector<8x128xf32>
    %cst_86 = arith.constant 1.000000e+00 : f32
    %246 = vector.broadcast %cst_86 : f32 to vector<8x128xf32>
    %247 = arith.subf %246, %238 : vector<8x128xf32>
    %248 = arith.mulf %247, %245 : vector<8x128xf32>
    %249 = arith.mulf %238, %210 : vector<8x128xf32>
    %250 = arith.addf %248, %249 : vector<8x128xf32>
    %251 = arith.index_cast %c5_i32 : i32 to index
    %c0_87 = arith.constant 0 : index
    %c0_88 = arith.constant 0 : index
    %252 = vector.load %arg7[%251, %c0_87, %c0_88] : memref<8x8x128xf32, #tpu.memory_space<vmem>>, vector<1x8x128xf32>
    %253 = vector.shape_cast %252 : vector<1x8x128xf32> to vector<8x128xf32>
    %254 = vector.shape_cast %250 : vector<8x128xf32> to vector<1x8x128xf32>
    tpu.vector_store %arg7[%251, %c0_87, %c0_88], %254 {strides = array<i32>} : memref<8x8x128xf32, #tpu.memory_space<vmem>>, vector<1x8x128xf32>,
    %c6_i32 = arith.constant 6 : i32
    %255 = arith.index_cast %c6_i32 : i32 to index
    %c0_89 = arith.constant 0 : index
    %c0_90 = arith.constant 0 : index
    %256 = vector.load %arg9[%255, %c0_89, %c0_90] : memref<8x8x384xf32, #tpu.memory_space<vmem>>, vector<1x8x384xf32>
    %257 = vector.shape_cast %256 : vector<1x8x384xf32> to vector<8x384xf32>
    %cst_91 = arith.constant dense<0.000000e+00> : vector<8x384xf32>
    %258 = tpu.matmul %250, %4, %cst_91 {dimension_numbers = #tpu.dot_dimension_numbers<[1], [0], [0], [1], [0, 0, 1, 1], [], []>} : vector<8x128xf32>, vector<128x384xf32>, vector<8x384xf32> -> vector<8x384xf32>
    %259 = vector.extract_strided_slice %257 {offsets = [0, 0], sizes = [8, 128], strides = [1, 1]} : vector<8x384xf32> to vector<8x128xf32>
    %260 = vector.extract_strided_slice %258 {offsets = [0, 0], sizes = [8, 128], strides = [1, 1]} : vector<8x384xf32> to vector<8x128xf32>
    %261 = arith.addf %259, %260 : vector<8x128xf32>
    %cst_92 = arith.constant 5.000000e-01 : f32
    %262 = vector.broadcast %cst_92 : f32 to vector<8x128xf32>
    %263 = arith.mulf %262, %261 : vector<8x128xf32>
    %264 = math.tanh %263 : vector<8x128xf32>
    %cst_93 = arith.constant 5.000000e-01 : f32
    %265 = vector.broadcast %cst_93 : f32 to vector<8x128xf32>
    %266 = arith.mulf %265, %264 : vector<8x128xf32>
    %cst_94 = arith.constant 5.000000e-01 : f32
    %267 = vector.broadcast %cst_94 : f32 to vector<8x128xf32>
    %268 = arith.addf %266, %267 : vector<8x128xf32>
    %269 = vector.extract_strided_slice %257 {offsets = [0, 128], sizes = [8, 128], strides = [1, 1]} : vector<8x384xf32> to vector<8x128xf32>
    %270 = vector.extract_strided_slice %258 {offsets = [0, 128], sizes = [8, 128], strides = [1, 1]} : vector<8x384xf32> to vector<8x128xf32>
    %271 = arith.addf %269, %270 : vector<8x128xf32>
    %cst_95 = arith.constant 5.000000e-01 : f32
    %272 = vector.broadcast %cst_95 : f32 to vector<8x128xf32>
    %273 = arith.mulf %272, %271 : vector<8x128xf32>
    %274 = math.tanh %273 : vector<8x128xf32>
    %cst_96 = arith.constant 5.000000e-01 : f32
    %275 = vector.broadcast %cst_96 : f32 to vector<8x128xf32>
    %276 = arith.mulf %275, %274 : vector<8x128xf32>
    %cst_97 = arith.constant 5.000000e-01 : f32
    %277 = vector.broadcast %cst_97 : f32 to vector<8x128xf32>
    %278 = arith.addf %276, %277 : vector<8x128xf32>
    %279 = vector.extract_strided_slice %257 {offsets = [0, 256], sizes = [8, 128], strides = [1, 1]} : vector<8x384xf32> to vector<8x128xf32>
    %280 = vector.extract_strided_slice %258 {offsets = [0, 256], sizes = [8, 128], strides = [1, 1]} : vector<8x384xf32> to vector<8x128xf32>
    %281 = vector.broadcast %5 : vector<1x128xf32> to vector<8x128xf32>
    %282 = arith.addf %280, %281 : vector<8x128xf32>
    %283 = arith.mulf %268, %282 : vector<8x128xf32>
    %284 = arith.addf %279, %283 : vector<8x128xf32>
    %285 = math.tanh %284 : vector<8x128xf32>
    %cst_98 = arith.constant 1.000000e+00 : f32
    %286 = vector.broadcast %cst_98 : f32 to vector<8x128xf32>
    %287 = arith.subf %286, %278 : vector<8x128xf32>
    %288 = arith.mulf %287, %285 : vector<8x128xf32>
    %289 = arith.mulf %278, %250 : vector<8x128xf32>
    %290 = arith.addf %288, %289 : vector<8x128xf32>
    %291 = arith.index_cast %c6_i32 : i32 to index
    %c0_99 = arith.constant 0 : index
    %c0_100 = arith.constant 0 : index
    %292 = vector.load %arg7[%291, %c0_99, %c0_100] : memref<8x8x128xf32, #tpu.memory_space<vmem>>, vector<1x8x128xf32>
    %293 = vector.shape_cast %292 : vector<1x8x128xf32> to vector<8x128xf32>
    %294 = vector.shape_cast %290 : vector<8x128xf32> to vector<1x8x128xf32>
    tpu.vector_store %arg7[%291, %c0_99, %c0_100], %294 {strides = array<i32>} : memref<8x8x128xf32, #tpu.memory_space<vmem>>, vector<1x8x128xf32>,
    %c7_i32 = arith.constant 7 : i32
    %295 = arith.index_cast %c7_i32 : i32 to index
    %c0_101 = arith.constant 0 : index
    %c0_102 = arith.constant 0 : index
    %296 = vector.load %arg9[%295, %c0_101, %c0_102] : memref<8x8x384xf32, #tpu.memory_space<vmem>>, vector<1x8x384xf32>
    %297 = vector.shape_cast %296 : vector<1x8x384xf32> to vector<8x384xf32>
    %cst_103 = arith.constant dense<0.000000e+00> : vector<8x384xf32>
    %298 = tpu.matmul %290, %4, %cst_103 {dimension_numbers = #tpu.dot_dimension_numbers<[1], [0], [0], [1], [0, 0, 1, 1], [], []>} : vector<8x128xf32>, vector<128x384xf32>, vector<8x384xf32> -> vector<8x384xf32>
    %299 = vector.extract_strided_slice %297 {offsets = [0, 0], sizes = [8, 128], strides = [1, 1]} : vector<8x384xf32> to vector<8x128xf32>
    %300 = vector.extract_strided_slice %298 {offsets = [0, 0], sizes = [8, 128], strides = [1, 1]} : vector<8x384xf32> to vector<8x128xf32>
    %301 = arith.addf %299, %300 : vector<8x128xf32>
    %cst_104 = arith.constant 5.000000e-01 : f32
    %302 = vector.broadcast %cst_104 : f32 to vector<8x128xf32>
    %303 = arith.mulf %302, %301 : vector<8x128xf32>
    %304 = math.tanh %303 : vector<8x128xf32>
    %cst_105 = arith.constant 5.000000e-01 : f32
    %305 = vector.broadcast %cst_105 : f32 to vector<8x128xf32>
    %306 = arith.mulf %305, %304 : vector<8x128xf32>
    %cst_106 = arith.constant 5.000000e-01 : f32
    %307 = vector.broadcast %cst_106 : f32 to vector<8x128xf32>
    %308 = arith.addf %306, %307 : vector<8x128xf32>
    %309 = vector.extract_strided_slice %297 {offsets = [0, 128], sizes = [8, 128], strides = [1, 1]} : vector<8x384xf32> to vector<8x128xf32>
    %310 = vector.extract_strided_slice %298 {offsets = [0, 128], sizes = [8, 128], strides = [1, 1]} : vector<8x384xf32> to vector<8x128xf32>
    %311 = arith.addf %309, %310 : vector<8x128xf32>
    %cst_107 = arith.constant 5.000000e-01 : f32
    %312 = vector.broadcast %cst_107 : f32 to vector<8x128xf32>
    %313 = arith.mulf %312, %311 : vector<8x128xf32>
    %314 = math.tanh %313 : vector<8x128xf32>
    %cst_108 = arith.constant 5.000000e-01 : f32
    %315 = vector.broadcast %cst_108 : f32 to vector<8x128xf32>
    %316 = arith.mulf %315, %314 : vector<8x128xf32>
    %cst_109 = arith.constant 5.000000e-01 : f32
    %317 = vector.broadcast %cst_109 : f32 to vector<8x128xf32>
    %318 = arith.addf %316, %317 : vector<8x128xf32>
    %319 = vector.extract_strided_slice %297 {offsets = [0, 256], sizes = [8, 128], strides = [1, 1]} : vector<8x384xf32> to vector<8x128xf32>
    %320 = vector.extract_strided_slice %298 {offsets = [0, 256], sizes = [8, 128], strides = [1, 1]} : vector<8x384xf32> to vector<8x128xf32>
    %321 = vector.broadcast %5 : vector<1x128xf32> to vector<8x128xf32>
    %322 = arith.addf %320, %321 : vector<8x128xf32>
    %323 = arith.mulf %308, %322 : vector<8x128xf32>
    %324 = arith.addf %319, %323 : vector<8x128xf32>
    %325 = math.tanh %324 : vector<8x128xf32>
    %cst_110 = arith.constant 1.000000e+00 : f32
    %326 = vector.broadcast %cst_110 : f32 to vector<8x128xf32>
    %327 = arith.subf %326, %318 : vector<8x128xf32>
    %328 = arith.mulf %327, %325 : vector<8x128xf32>
    %329 = arith.mulf %318, %290 : vector<8x128xf32>
    %330 = arith.addf %328, %329 : vector<8x128xf32>
    %331 = arith.index_cast %c7_i32 : i32 to index
    %c0_111 = arith.constant 0 : index
    %c0_112 = arith.constant 0 : index
    %332 = vector.load %arg7[%331, %c0_111, %c0_112] : memref<8x8x128xf32, #tpu.memory_space<vmem>>, vector<1x8x128xf32>
    %333 = vector.shape_cast %332 : vector<1x8x128xf32> to vector<8x128xf32>
    %334 = vector.shape_cast %330 : vector<8x128xf32> to vector<1x8x128xf32>
    tpu.vector_store %arg7[%331, %c0_111, %c0_112], %334 {strides = array<i32>} : memref<8x8x128xf32, #tpu.memory_space<vmem>>, vector<1x8x128xf32>,
    %c8_i32 = arith.constant 8 : i32
    %c0_113 = arith.constant 0 : index
    %c0_114 = arith.constant 0 : index
    %335 = vector.load %arg8[%c0_113, %c0_114] : memref<8x128xf32, #tpu.memory_space<vmem>>, vector<8x128xf32>
    tpu.vector_store %arg8[%c0_113, %c0_114], %330 {strides = array<i32>} : memref<8x128xf32, #tpu.memory_space<vmem>>, vector<8x128xf32>,
    return
  }
  func.func @transform_0(%arg0: i32, %arg1: i32) -> (i32, i32, i32) {
    %c0_i32 = arith.constant 0 : i32
    %c0_i32_0 = arith.constant 0 : i32
    return %arg1, %arg0, %c0_i32 : i32, i32, i32
  }
  func.func @transform_1(%arg0: i32, %arg1: i32) -> (i32, i32) {
    %c0_i32 = arith.constant 0 : i32
    %c0_i32_0 = arith.constant 0 : i32
    %c0_i32_1 = arith.constant 0 : i32
    return %c0_i32, %c0_i32_0 : i32, i32
  }
  func.func @transform_2(%arg0: i32, %arg1: i32) -> (i32, i32) {
    %c0_i32 = arith.constant 0 : i32
    %c0_i32_0 = arith.constant 0 : i32
    %c0_i32_1 = arith.constant 0 : i32
    return %c0_i32, %c0_i32_0 : i32, i32
  }
  func.func @transform_3(%arg0: i32, %arg1: i32) -> (i32, i32) {
    %c0_i32 = arith.constant 0 : i32
    %c0_i32_0 = arith.constant 0 : i32
    %c0_i32_1 = arith.constant 0 : i32
    return %c0_i32, %c0_i32_0 : i32, i32
  }
  func.func @transform_4(%arg0: i32, %arg1: i32) -> (i32, i32) {
    %c0_i32 = arith.constant 0 : i32
    %c0_i32_0 = arith.constant 0 : i32
    %c0_i32_1 = arith.constant 0 : i32
    return %c0_i32, %c0_i32_0 : i32, i32
  }
  func.func @transform_5(%arg0: i32, %arg1: i32) -> (i32, i32, i32) {
    %c0_i32 = arith.constant 0 : i32
    %c0_i32_0 = arith.constant 0 : i32
    return %arg1, %arg0, %c0_i32 : i32, i32, i32
  }
}

</mosaic_0001>

<bundles_post_ra>
// kernel: gru_encoder_pallas.1
= control target key start
LH: loop header
LB: loop body
LE: loop exit
PB: predicated region body
PF: predicated region fallthrough
CT: control target
= control target key end

     0   :  { %10 = vsyncpa [#allocation5], 0  ;;  %s1110_s21 = smov [#allocation4]   ;;  %s1111_s23 = smov 384   ;;  %s1876_s0 = inlined_call_operand.vmem [shape: f32[8,8,16], index: 0, kind: input, shape index: {}]   ;;  %s1877_s1 = inlined_call_operand.vmem [shape: f32[16,384], index: 1, kind: input, shape index: {}]   ;;  %s1878_s2 = inlined_call_operand.vmem [shape: f32[1,384], index: 2, kind: input, shape index: {}]   ;;  %s1879_s3 = inlined_call_operand.hbm [shape: f32[128,384], index: 3, kind: input, shape index: {}]   ;;  %s1880_s4 = inlined_call_operand.vmem [shape: f32[1,128], index: 4, kind: input, shape index: {}]   ;;  %s1881_s5 = inlined_call_operand.vmem [shape: f32[8,8,128], index: 5, kind: output, shape index: {}]  }
   0x1   :  { %s21_s20 = sshll.u32 %s1879_s3, 4  ;;  %s23_s22 = sshll.u32 %s1110_s21, 4  ;;  %s22_s20 = int_to_ptr.hbm [resolvable:$true] %s21_s20  ;;  %s24_s22 = int_to_ptr.vmem [resolvable:$true] %s23_s22 }
   0x2   :  { %s1112_s24 = smov 24  }
   0x3   :  { %29 = dma.hbm_to_vmem [thread:$0]  %s22_s20, 6144, %s24_s22, [#allocation5], %s1111_s23, %s1111_s23, %s1112_s24  }
   0x4   :  { %1108 = dma.done.wait [#allocation5], 6144  }
   0x5   :  { %1109 = vsyncadd [#allocation5], 4294961152  ;;  %v44_v0 = vld [vmem:[%s1877_s1 + $0x18] sm:$0xff]  ;;  %v1150_v1 = vld [vmem:[#allocation4 + $0x168] sm:$0xff]  ;;  %vm112_vm0 = vcmask 130048   ;;  %v1113_v45 = vmov 0.0  }
   0x6   :  { %v41_v2 = vld [vmem:[%s1877_s1] sm:$0xff]  ;;  %151 = vmatpush.msra.mxu0 %v44_v0  ;;  %288 = vmatpush.msra.mxu3 %v1150_v1  ;;  %v1156_v3 = vld [vmem:[#allocation4 + $0x150] sm:$0xff]  ;;  %v1163_v5 = vld [vmem:[#allocation4 + $0x138] sm:$0xff] }
   0x7   :  { %v1161_v4 = vld [vmem:[%s1876_s0] sm:$0xff]  ;;  %995 = vmatpush.msra.mxu2 %v44_v0  ;;  %v1170_v7 = vld [vmem:[#allocation4 + $0x178] sm:$0xff]  ;;  %v1176_v9 = vld [vmem:[#allocation4 + $0x108] sm:$0xff] }
   0x8   :  { %152 = vmatpush.msra.mxu0 %v41_v2  ;;  %289 = vmatpush.msra.mxu3 %v1156_v3  ;;  %v1168_v6 = vld [vmem:[#allocation4 + $0x120] sm:$0xff]  ;;  %v1178_v10 = vld [vmem:[#allocation4 + $0x148] sm:$0xff]  ;;  %v1182_v11 = vld [vmem:[#allocation4 + $0xf0] sm:$0xff] }
   0x9   :  { %964 = vmatmul.msk.f32.vlgmr.msra.gmra.mxu0 %vm112_vm0, %v1161_v4  ;;  %996 = vmatpush.msra.mxu2 %v41_v2  ;;  %v1174_v8 = vld [vmem:[#allocation4 + $0x160] sm:$0xff]  ;;  %v1184_v12 = vld [vmem:[#allocation4 + $0x130] sm:$0xff]  ;;  %v1190_v13 = vld [vmem:[%s1876_s0 + $0x8] sm:$0xff] }
   0xa   :  { %290 = vmatpush.msra.mxu3 %v1163_v5  ;;  %328 = vmatpush.msrb.mxu0 %v1170_v7  ;;  %v1193_v14 = vld [vmem:[#allocation4 + $0xd8] sm:$0xff]  ;;  %v1206_v17 = vld [vmem:[#allocation4 + $0xc0] sm:$0xff]  ;;  %v1217_v20 = vld [vmem:[#allocation4 + $0xa8] sm:$0xff] }
   0xb   :  { %v1195_v15 = vld [vmem:[#allocation4 + $0x118] sm:$0xff]  ;;  %v1208_v18 = vld [vmem:[#allocation4 + $0x100] sm:$0xff]  ;;  %v1219_v21 = vld [vmem:[#allocation4 + $0xe8] sm:$0xff] }
   0xc   :  { %291 = vmatpush.msra.mxu3 %v1168_v6  ;;  %329 = vmatpush.msrb.mxu0 %v1174_v8  ;;  %v1202_v16 = vld [vmem:[%s1876_s0 + $0x38] sm:$0xff]  ;;  %v45_v19 = vld [vmem:[%s1877_s1 + $0x20] sm:$0xff]  ;;  %v42_v22 = vld [vmem:[%s1877_s1 + $0x8] sm:$0xff] }
   0xd   :  { %971 = vmatmul.msk.f32.vlgmr.msra.gmra.mxu2 %vm112_vm0, %v1202_v16  ;;  %192 = vmatpush.msra.mxu1 %v45_v19  ;;  %v1226_v23 = vld [vmem:[#allocation4 + $0x90] sm:$0xff]  ;;  %v1237_v26 = vld [vmem:[#allocation4 + $0x78] sm:$0xff]  ;;  %v1247_v28 = vld [vmem:[#allocation4 + $0x60] sm:$0xff] }
   0xe   :  { %292 = vmatpush.msra.mxu3 %v1176_v9  ;;  %330 = vmatpush.msrb.mxu0 %v1178_v10  ;;  %v1228_v24 = vld [vmem:[#allocation4 + $0xd0] sm:$0xff]  ;;  %v1239_v27 = vld [vmem:[#allocation4 + $0xb8] sm:$0xff]  ;;  %v1249_v29 = vld [vmem:[#allocation4 + $0xa0] sm:$0xff] }
   0xf   :  { %997 = vmatpush.msrb.mxu2 %v45_v19  ;;  %193 = vmatpush.msra.mxu1 %v42_v22  ;;  %v1234_v25 = vld [vmem:[%s1876_s0 + $0x10] sm:$0xff]  ;;  %v46_v30 = vld [vmem:[%s1877_s1 + $0x28] sm:$0xff]  ;;  %v1277_v36 = vld [vmem:[%s1876_s0 + $0x18] sm:$0xff] }
  0x10   :  { %293 = vmatpush.msra.mxu3 %v1182_v11  ;;  %331 = vmatpush.msrb.mxu0 %v1184_v12  ;;  %v1258_v31 = vld [vmem:[#allocation4 + $0x48] sm:$0xff]  ;;  %v43_v33 = vld [vmem:[%s1877_s1 + $0x10] sm:$0xff]  ;;  %v1282_v38 = vld [vmem:[#allocation4 + $0x18] sm:$0xff] }
  0x11   :  { %965 = vmatmul.msk.f32.gmra.mxu0 %vm112_vm0, %v1190_v13  ;;  %998 = vmatpush.msrb.mxu2 %v42_v22  ;;  %v1260_v32 = vld [vmem:[#allocation4 + $0x88] sm:$0xff]  ;;  %v1268_v34 = vld [vmem:[#allocation4 + $0x30] sm:$0xff]  ;;  %1899 = vst [vmem:[#allocation7_spill] sm:$0xff] %v1282_v38  ;;  %v1284_v39 = vld [vmem:[#allocation4 + $0x58] sm:$0xff] }
  0x12   :  { %294 = vmatpush.msra.mxu3 %v1193_v14  ;;  %332 = vmatpush.msrb.mxu0 %v1195_v15  ;;  %v1270_v35 = vld [vmem:[#allocation4 + $0x70] sm:$0xff]  ;;  %v1292_v40 = vld [vmem:[#allocation4] sm:$0xff]  ;;  %v1299_v42 = vld [vmem:[#allocation4 + $0x158] sm:$0xff] }
  0x13   :  { %972 = vmatmul.msk.f32.vlgmr.msra.gmra.mxu1 %vm112_vm0, %v1161_v4  ;;  %233 = vmatpush.msra.mxu2 %v46_v30  ;;  %v1279_v37 = vld [vmem:[#allocation4 + $0x170] sm:$0xff]  ;;  %1900 = vst [vmem:[#allocation8_spill] sm:$0xff] %v1292_v40  ;;  %v1294_v41 = vld [vmem:[#allocation4 + $0x40] sm:$0xff]  ;;  %v1302_v43 = vld [vmem:[#allocation4 + $0x28] sm:$0xff] }
  0x14   :  { %295 = vmatpush.msra.mxu3 %v1206_v17  ;;  %333 = vmatpush.msrb.mxu0 %v1208_v18  ;;  %1901 = vst [vmem:[#allocation9_spill] sm:$0xff] %v1302_v43  ;;  %v1308_v44 = vld [vmem:[#allocation4 + $0x140] sm:$0xff]  ;;  %v1312_v46 = vld [vmem:[#allocation4 + $0x10] sm:$0xff]  ;;  %v1321_v48 = vld [vmem:[#allocation4 + $0x128] sm:$0xff] }
  0x15   :  { %979 = vmatmul.msk.f32.vlgmr.msrb.gmra.mxu2 %vm112_vm0, %v1202_v16  ;;  %374 = vmatpush.msrb.mxu1 %v1150_v1  ;;  %1902 = vst [vmem:[#allocation10_spill] sm:$0xff] %v1312_v46  ;;  %v1319_v47 = vld [vmem:[%s1876_s0 + $0x20] sm:$0xff]  ;;  %v1330_v49 = vld [vmem:[#allocation4 + $0x110] sm:$0xff]  ;;  %v1336_v50 = vld [vmem:[#allocation4 + $0xf8] sm:$0xff] }
  0x16   :  { %296 = vmatpush.msra.mxu3 %v1217_v20  ;;  %334 = vmatpush.msrb.mxu0 %v1219_v21  ;;  %v1349_v51 = vld [vmem:[%s1876_s0 + $0x28] sm:$0xff]  ;;  %v1351_v52 = vld [vmem:[#allocation4 + $0xe0] sm:$0xff]  ;;  %v1366_v54 = vld [vmem:[#allocation4 + $0xb0] sm:$0xff] }
  0x17   :  { %234 = vmatpush.msra.mxu2 %v43_v33  ;;  %375 = vmatpush.msrb.mxu1 %v1156_v3  ;;  %v1360_v53 = vld [vmem:[#allocation4 + $0xc8] sm:$0xff]  ;;  %v1372_v55 = vld [vmem:[#allocation4 + $0x98] sm:$0xff]  ;;  %v102_v56 = vld [vmem:[%s1876_s0 + $0x30] sm:$0xff] }
  0x18   :  { %297 = vmatpush.msra.mxu3 %v1226_v23  ;;  %335 = vmatpush.msrb.mxu0 %v1228_v24  ;;  %v1382_v57 = vld [vmem:[#allocation4 + $0x80] sm:$0xff]  ;;  %v1389_v58 = vld [vmem:[#allocation4 + $0x68] sm:$0xff]  ;;  %v1395_v59 = vld [vmem:[#allocation4 + $0x50] sm:$0xff] }
  0x19   :  { %966 = vmatmul.msk.f32.gmra.mxu0 %vm112_vm0, %v1234_v25  ;;  %394 = vmatpush.msrb.mxu2 %v1279_v37  ;;  %v1401_v60 = vld [vmem:[#allocation4 + $0x38] sm:$0xff]  ;;  %v1408_v61 = vld [vmem:[#allocation4 + $0x20] sm:$0xff]  ;;  %v1415_v62 = vld [vmem:[#allocation4 + $0x8] sm:$0xff] }
  0x1a   :  { %298 = vmatpush.msra.mxu3 %v1237_v26  ;;  %336 = vmatpush.msrb.mxu0 %v1239_v27  ;;  %1903 = vst [vmem:[#allocation11_spill] sm:$0xff] %v1401_v60  ;;  %v104_v0 = vld [vmem:[%s1878_s2] sm:$0x7] }
  0x1b   :  { %376 = vmatpush.msrb.mxu1 %v1163_v5  ;;  %395 = vmatpush.msrb.mxu2 %v1299_v42  ;;  %1904 = vst [vmem:[#allocation12_spill] sm:$0xff] %v1408_v61  ;;  %v106_v2 = vperm.slane %v104_v0, 0 }
  0x1c   :  { %299 = vmatpush.msra.mxu3 %v1247_v28  ;;  %337 = vmatpush.msrb.mxu0 %v1249_v29  ;;  %1905 = vst [vmem:[#allocation13_spill] sm:$0xff] %v1415_v62 }
  0x1d   :  { %980 = vmatmul.msk.f32.vlgmr.msra.gmra.mxu2 %vm112_vm0, %v1161_v4  ;;  %973 = vmatmul.msk.f32.gmra.mxu1 %vm112_vm0, %v1190_v13 }
  0x1e   :  { %300 = vmatpush.msra.mxu3 %v1258_v31  ;;  %338 = vmatpush.msrb.mxu0 %v1260_v32 }
  0x1f   :  { %396 = vmatpush.msrb.mxu2 %v1308_v44  ;;  %377 = vmatpush.msrb.mxu1 %v1168_v6 }
  0x20   :  { %301 = vmatpush.msra.mxu3 %v1268_v34  ;;  %339 = vmatpush.msrb.mxu0 %v1270_v35 }
  0x21   :  { %967 = vmatmul.msk.f32.gmra.mxu0 %vm112_vm0, %v1277_v36  ;;  %397 = vmatpush.msrb.mxu2 %v1321_v48 }
  0x22   :  { %302 = vmatpush.msra.mxu3 %v1282_v38  ;;  %340 = vmatpush.msrb.mxu0 %v1284_v39 }
  0x23   :  { %398 = vmatpush.msrb.mxu2 %v1330_v49  ;;  %378 = vmatpush.msrb.mxu1 %v1176_v9 }
  0x24   :  { %303 = vmatpush.msra.mxu3 %v1292_v40  ;;  %341 = vmatpush.msrb.mxu0 %v1294_v41 }
  0x25   :  { %304 = vmatmul.f32.vlgmr.msra.gmra.mxu3 %v1113_v45  ;;  %981 = vmatmul.msk.f32.gmra.mxu2 %vm112_vm0, %v1190_v13 }
  0x26   :  { %308 = vmatpush.msrb.mxu3 %v1279_v37  ;;  %342 = vmatpush.msrb.mxu0 %v1302_v43 }
  0x27   :  { %399 = vmatpush.msrb.mxu2 %v1336_v50  ;;  %974 = vmatmul.msk.f32.gmra.mxu1 %vm112_vm0, %v1234_v25 }
  0x28   :  { %309 = vmatpush.msrb.mxu3 %v1299_v42  ;;  %343 = vmatpush.msrb.mxu0 %v1312_v46 }
  0x29   :  { %968 = vmatmul.msk.f32.gmra.mxu0 %vm112_vm0, %v1319_v47  ;;  %379 = vmatpush.msrb.mxu1 %v1182_v11 }
  0x2a   :  { %310 = vmatpush.msrb.mxu3 %v1308_v44  ;;  %458 = vmatpush.msra.mxu0 %v1150_v1 }
  0x2b   :  { %400 = vmatpush.msrb.mxu2 %v1351_v52  ;;  %380 = vmatpush.msrb.mxu1 %v1193_v14 }
  0x2c   :  { %311 = vmatpush.msrb.mxu3 %v1321_v48  ;;  %459 = vmatpush.msra.mxu0 %v1156_v3 }
  0x2d   :  { %982 = vmatmul.msk.f32.gmra.mxu2 %vm112_vm0, %v1234_v25  ;;  %381 = vmatpush.msrb.mxu1 %v1206_v17 }
  0x2e   :  { %312 = vmatpush.msrb.mxu3 %v1330_v49  ;;  %460 = vmatpush.msra.mxu0 %v1163_v5 }
  0x2f   :  { %401 = vmatpush.msrb.mxu2 %v1360_v53  ;;  %975 = vmatmul.msk.f32.gmra.mxu1 %vm112_vm0, %v1277_v36 }
  0x30   :  { %313 = vmatpush.msrb.mxu3 %v1336_v50  ;;  %461 = vmatpush.msra.mxu0 %v1168_v6 }
  0x31   :  { %969 = vmatmul.msk.f32.gmra.mxu0 %vm112_vm0, %v1349_v51  ;;  %402 = vmatpush.msrb.mxu2 %v1366_v54 }
  0x32   :  { %314 = vmatpush.msrb.mxu3 %v1351_v52  ;;  %462 = vmatpush.msra.mxu0 %v1176_v9 }
  0x33   :  { %382 = vmatpush.msrb.mxu1 %v1217_v20  ;;  %403 = vmatpush.msrb.mxu2 %v1372_v55 }
  0x34   :  { %315 = vmatpush.msrb.mxu3 %v1360_v53  ;;  %463 = vmatpush.msra.mxu0 %v1182_v11 }
  0x35   :  { %383 = vmatpush.msrb.mxu1 %v1226_v23  ;;  %983 = vmatmul.msk.f32.gmra.mxu2 %vm112_vm0, %v1277_v36 }
  0x36   :  { %316 = vmatpush.msrb.mxu3 %v1366_v54  ;;  %404 = vmatpush.msrb.mxu2 %v1382_v57 }
  0x37   :  { %384 = vmatpush.msrb.mxu1 %v1237_v26  ;;  %464 = vmatpush.msra.mxu0 %v1193_v14 }
  0x38   :  { %317 = vmatpush.msrb.mxu3 %v1372_v55  ;;  %976 = vmatmul.msk.f32.gmra.mxu1 %vm112_vm0, %v1319_v47 }
  0x39   :  { %970 = vmatmul.msk.f32.gmra.mxu0 %vm112_vm0, %v102_v56  ;;  %385 = vmatpush.msrb.mxu1 %v1247_v28 }
  0x3a   :  { %318 = vmatpush.msrb.mxu3 %v1382_v57  ;;  %405 = vmatpush.msrb.mxu2 %v1389_v58 }
  0x3b   :  { %386 = vmatpush.msrb.mxu1 %v1258_v31  ;;  %465 = vmatpush.msra.mxu0 %v1206_v17 }
  0x3c   :  { %319 = vmatpush.msrb.mxu3 %v1389_v58  ;;  %406 = vmatpush.msrb.mxu2 %v1395_v59 }
  0x3d   :  { %387 = vmatpush.msrb.mxu1 %v1268_v34  ;;  %984 = vmatmul.msk.f32.gmra.mxu2 %vm112_vm0, %v1319_v47 }
  0x3e   :  { %320 = vmatpush.msrb.mxu3 %v1395_v59  ;;  %407 = vmatpush.msrb.mxu2 %v1401_v60 }
  0x3f   :  { %388 = vmatpush.msrb.mxu1 %v1282_v38  ;;  %466 = vmatpush.msra.mxu0 %v1217_v20 }
  0x40   :  { %321 = vmatpush.msrb.mxu3 %v1401_v60  ;;  %408 = vmatpush.msrb.mxu2 %v1408_v61 }
  0x41   :  { %344 = vmatmul.f32.vlgmr.msrb.gmra.mxu0 %v1113_v45  ;;  %977 = vmatmul.msk.f32.gmra.mxu1 %vm112_vm0, %v1349_v51 }
  0x42   :  { %322 = vmatpush.msrb.mxu3 %v1408_v61  ;;  %389 = vmatpush.msrb.mxu1 %v1292_v40 }
  0x43   :  { %409 = vmatpush.msrb.mxu2 %v1415_v62  ;;  %467 = vmatpush.msra.mxu0 %v1226_v23 }
  0x44   :  { %323 = vmatpush.msrb.mxu3 %v1415_v62  ;;  %478 = vmatpush.msra.mxu1 %v1279_v37 }
  0x45   :  { %324 = vmatmul.f32.vlgmr.msrb.gmra.mxu3 %v1113_v45  ;;  %498 = vmatpush.msra.mxu2 %v1170_v7 }
  0x46   :  { %414 = vmatpush.msra.mxu3 %v1170_v7  ;;  %985 = vmatmul.msk.f32.gmra.mxu2 %vm112_vm0, %v1349_v51 }
  0x47   :  { %479 = vmatpush.msra.mxu1 %v1299_v42  ;;  %499 = vmatpush.msra.mxu2 %v1174_v8 }
  0x48   :  { %415 = vmatpush.msra.mxu3 %v1174_v8  ;;  %468 = vmatpush.msra.mxu0 %v1237_v26 }
  0x49   :  { %480 = vmatpush.msra.mxu1 %v1308_v44  ;;  %500 = vmatpush.msra.mxu2 %v1178_v10 }
  0x4a   :  { %416 = vmatpush.msra.mxu3 %v1178_v10  ;;  %978 = vmatmul.msk.f32.gmra.mxu1 %vm112_vm0, %v102_v56 }
  0x4b   :  { %481 = vmatpush.msra.mxu1 %v1321_v48  ;;  %501 = vmatpush.msra.mxu2 %v1184_v12 }
  0x4c   :  { %417 = vmatpush.msra.mxu3 %v1184_v12  ;;  %469 = vmatpush.msra.mxu0 %v1247_v28 }
  0x4d   :  { %482 = vmatpush.msra.mxu1 %v1330_v49  ;;  %502 = vmatpush.msra.mxu2 %v1195_v15 }
  0x4e   :  { %418 = vmatpush.msra.mxu3 %v1195_v15  ;;  %986 = vmatmul.msk.f32.gmra.mxu2 %vm112_vm0, %v102_v56 }
  0x4f   :  { %470 = vmatpush.msra.mxu0 %v1258_v31  ;;  %483 = vmatpush.msra.mxu1 %v1336_v50 }
  0x50   :  { %419 = vmatpush.msra.mxu3 %v1208_v18  ;;  %503 = vmatpush.msra.mxu2 %v1208_v18 }
  0x51   :  { %471 = vmatpush.msra.mxu0 %v1268_v34  ;;  %484 = vmatpush.msra.mxu1 %v1351_v52 }
  0x52   :  { %420 = vmatpush.msra.mxu3 %v1219_v21  ;;  %504 = vmatpush.msra.mxu2 %v1219_v21 }
  0x53   :  { %472 = vmatpush.msra.mxu0 %v1282_v38  ;;  %485 = vmatpush.msra.mxu1 %v1360_v53 }
  0x54   :  { %421 = vmatpush.msra.mxu3 %v1228_v24  ;;  %505 = vmatpush.msra.mxu2 %v1228_v24 }
  0x55   :  { %473 = vmatpush.msra.mxu0 %v1292_v40  ;;  %486 = vmatpush.msra.mxu1 %v1366_v54 }
  0x56   :  { %422 = vmatpush.msra.mxu3 %v1239_v27  ;;  %987 = vmatmul.msk.f32.gmra.mxu2 %vm112_vm0, %v1202_v16 }
  0x57   :  { %506 = vmatpush.msra.mxu2 %v1239_v27  ;;  %487 = vmatpush.msra.mxu1 %v1372_v55 }
  0x58   :  { %423 = vmatpush.msra.mxu3 %v1249_v29  ;;  %562 = vmatpush.msrb.mxu0 %v1279_v37 }
  0x59   :  { %507 = vmatpush.msra.mxu2 %v1249_v29  ;;  %488 = vmatpush.msra.mxu1 %v1382_v57 }
  0x5a   :  { %424 = vmatpush.msra.mxu3 %v1260_v32  ;;  %563 = vmatpush.msrb.mxu0 %v1299_v42 }
  0x5b   :  { %508 = vmatpush.msra.mxu2 %v1260_v32  ;;  %489 = vmatpush.msra.mxu1 %v1389_v58 }
  0x5c   :  { %425 = vmatpush.msra.mxu3 %v1270_v35  ;;  %564 = vmatpush.msrb.mxu0 %v1308_v44 }
  0x5d   :  { %509 = vmatpush.msra.mxu2 %v1270_v35  ;;  %490 = vmatpush.msra.mxu1 %v1395_v59 }
  0x5e   :  { %426 = vmatpush.msra.mxu3 %v1284_v39  ;;  %565 = vmatpush.msrb.mxu0 %v1321_v48 }
  0x5f   :  { %510 = vmatpush.msra.mxu2 %v1284_v39  ;;  %491 = vmatpush.msra.mxu1 %v1401_v60 }
  0x60   :  { %427 = vmatpush.msra.mxu3 %v1294_v41  ;;  %566 = vmatpush.msrb.mxu0 %v1330_v49 }
  0x61   :  { %511 = vmatpush.msra.mxu2 %v1294_v41  ;;  %492 = vmatpush.msra.mxu1 %v1408_v61 }
  0x62   :  { %428 = vmatpush.msra.mxu3 %v1302_v43  ;;  %567 = vmatpush.msrb.mxu0 %v1336_v50 }
  0x63   :  { %512 = vmatpush.msra.mxu2 %v1302_v43  ;;  %493 = vmatpush.msra.mxu1 %v1415_v62 }
  0x64   :  { %429 = vmatpush.msra.mxu3 %v1312_v46  ;;  %568 = vmatpush.msrb.mxu0 %v1351_v52 }
  0x65   :  { %513 = vmatpush.msra.mxu2 %v1312_v46 }
  0x66   :  { %542 = vmatpush.msrb.mxu3 %v1150_v1  ;;  %569 = vmatpush.msrb.mxu0 %v1360_v53 }
  0x68   :  { %543 = vmatpush.msrb.mxu3 %v1156_v3  ;;  %570 = vmatpush.msrb.mxu0 %v1366_v54 }
  0x6a   :  { %544 = vmatpush.msrb.mxu3 %v1163_v5  ;;  %571 = vmatpush.msrb.mxu0 %v1372_v55 }
  0x6c   :  { %545 = vmatpush.msrb.mxu3 %v1168_v6  ;;  %572 = vmatpush.msrb.mxu0 %v1382_v57 }
  0x6e   :  { %546 = vmatpush.msrb.mxu3 %v1176_v9  ;;  %573 = vmatpush.msrb.mxu0 %v1389_v58 }
  0x70   :  { %547 = vmatpush.msrb.mxu3 %v1182_v11  ;;  %574 = vmatpush.msrb.mxu0 %v1395_v59 }
  0x72   :  { %548 = vmatpush.msrb.mxu3 %v1193_v14  ;;  %575 = vmatpush.msrb.mxu0 %v1401_v60 }
  0x74   :  { %549 = vmatpush.msrb.mxu3 %v1206_v17  ;;  %576 = vmatpush.msrb.mxu0 %v1408_v61 }
  0x76   :  { %550 = vmatpush.msrb.mxu3 %v1217_v20  ;;  %577 = vmatpush.msrb.mxu0 %v1415_v62 }
  0x78   :  { %551 = vmatpush.msrb.mxu3 %v1226_v23 }
  0x7a   :  { %552 = vmatpush.msrb.mxu3 %v1237_v26 }
  0x7c   :  { %553 = vmatpush.msrb.mxu3 %v1247_v28 }
  0x7e   :  { %554 = vmatpush.msrb.mxu3 %v1258_v31 }
  0x80   :  { %555 = vmatpush.msrb.mxu3 %v1268_v34 }
  0x82   :  { %556 = vmatpush.msrb.mxu3 %v1282_v38 }
  0x84   :  { %557 = vmatpush.msrb.mxu3 %v1292_v40 }
  0x86   :  { %v154_v63 = vpop.f32.mrf.mxu0 }
  0x87   :  { %v155_v62 = vadd.f32 %v154_v63, %v106_v2 }
  0x8e   :  { %v157_v4 = vpop.f32.mrf.mxu0 }
  0x8f   :  { %v1526_v13 = vadd.f32 %v157_v4, %v106_v2 }
  0x90   :  { %v175_v16 = vpop.f32.mrf.mxu2 }
  0x91   :  { %1906 = vst [vmem:[#allocation14_spill] sm:$0xff] %v1526_v13  ;;  %v1528_v22 = vadd.f32 %v175_v16, %v106_v2 }
  0x93   :  { %1907 = vst [vmem:[#allocation15_spill] sm:$0xff] %v1528_v22  ;;  %v195_v22 = vpop.f32.mrf.mxu1 }
  0x96   :  { %v160_v19 = vpop.f32.mrf.mxu0 }
  0x97   :  { %v1530_v25 = vadd.f32 %v160_v19, %v106_v2  ;;  %v1542_v19 = vperm.slane %v104_v0, 1 }
  0x98   :  { %v1540_v16 = vpop.f32.mrf.mxu2 }
  0x99   :  { %1908 = vst [vmem:[#allocation16_spill] sm:$0xff] %v1530_v25 }
  0x9a   :  { %1913 = vst [vmem:[#allocation21_spill] sm:$0xff] %v1540_v16 }
  0x9b   :  { %1914 = vst [vmem:[#allocation22_spill] sm:$0xff] %v1542_v19 }
  0x9e   :  { %v163_v30 = vpop.f32.mrf.mxu0 }
  0x9f   :  { %v1532_v33 = vadd.f32 %v163_v30, %v106_v2 }
  0xa1   :  { %1909 = vst [vmem:[#allocation17_spill] sm:$0xff] %v1532_v33 }
  0xa6   :  { %v166_v36 = vpop.f32.mrf.mxu0 }
  0xa7   :  { %v1534_v45 = vadd.f32 %v166_v36, %v106_v2  ;;  %v1547_v36 = vld [vmem:[%s1880_s4] ss:$0 sm:$0xff] }
  0xa8   :  { %v305_v56 = vpop.f32.mrf.mxu3 }
  0xa9   :  { %1910 = vst [vmem:[#allocation18_spill] sm:$0xff] %v1534_v45  ;;  %v348_v40 = vadd.f32 %v305_v56, %v155_v62  ;;  %v196_v62 = vadd.f32 %v195_v22, %v1542_v19 }
  0xab   :  { %v349_v46 = vmul.f32 0.5, %v348_v40  ;;  %v236_v40 = vpop.f32.mrf.mxu2 }
  0xad   :  { %1004 = vtanh.f32 %v349_v46 }
  0xae   :  { %v169_v47 = vpop.f32.mrf.mxu0 }
  0xaf   :  { %v1536_v51 = vadd.f32 %v169_v47, %v106_v2 }
  0xb1   :  { %1911 = vst [vmem:[#allocation19_spill] sm:$0xff] %v1536_v51 }
  0xb3   :  { %v1005_v30 = vpop.eup %1004 }
  0xb4   :  { %v351_v51 = vmul.f32 0.5, %v1005_v30 }
  0xb6   :  { %v172_v4 = vpop.f32.mrf.mxu0  ;;  %v352_v56 = vadd.f32 0.5, %v351_v51  ;;  %v198_v51 = vpop.f32.mrf.mxu1 }
  0xb7   :  { %v1538_v13 = vadd.f32 %v172_v4, %v106_v2  ;;  %v1551_v2 = vperm.slane %v104_v0, 2 }
  0xb9   :  { %1912 = vst [vmem:[#allocation20_spill] sm:$0xff] %v1538_v13  ;;  %v237_v13 = vadd.f32 %v236_v40, %v1551_v2 }
  0xbe   :  { %v345_v47 = vpop.f32.mrf.mxu0 }
  0xbf   :  { %v361_v63 = vadd.f32 %v1547_v36, %v345_v47 }
  0xc1   :  { %v362_v16 = vmul.f32 %v361_v63, %v352_v56 }
  0xc3   :  { %v363_v33 = vadd.f32 %v362_v16, %v237_v13  ;;  %v1917_v13 = vld [vmem:[#allocation10_spill] sm:$0xff] }
  0xc8   :  { %v325_v46 = vpop.f32.mrf.mxu3 }
  0xc9   :  { %v353_v4 = vadd.f32 %v325_v46, %v196_v62 }
  0xcb   :  { %v354_v45 = vmul.f32 0.5, %v353_v4 }
  0xcd   :  { %1006 = vtanh.f32 %v354_v45  ;;  %v239_v45 = vpop.f32.mrf.mxu2 }
  0xce   :  { %1008 = vtanh.f32 %v363_v33  ;;  %v1919_v33 = vld [vmem:[#allocation13_spill] sm:$0xff] }
  0xd3   :  { %v1007_v25 = vpop.eup %1006 }
  0xd4   :  { %v356_v61 = vmul.f32 0.5, %v1007_v25  ;;  %v1009_v22 = vpop.eup %1008  ;;  %v1918_v25 = vld [vmem:[#allocation8_spill] sm:$0xff] }
  0xd5   :  { %v1611_v16 = vpop.f32.mrf.mxu2 }
  0xd6   :  { %v357_v30 = vadd.f32 0.5, %v356_v61  ;;  %v1916_v61 = vld [vmem:[#allocation12_spill] sm:$0xff]  ;;  %1920 = vst [vmem:[#allocation23_spill] sm:$0xff] %v1611_v16 }
  0xd8   :  { %v365_v38 = vsub.f32 1.0, %v357_v30  ;;  %v367_v47 = vmul.f32 0.0, %v357_v30 }
  0xda   :  { %v366_v19 = vmul.f32 %v1009_v22, %v365_v38  ;;  %v1915_v38 = vld [vmem:[#allocation7_spill] sm:$0xff] }
  0xdc   :  { %v1554_v0 = vadd.f32 %v367_v47, %v366_v19  ;;  %v1613_v19 = vpop.f32.mrf.mxu1 }
  0xdd   :  { %1921 = vst [vmem:[#allocation24_spill] sm:$0xff] %v1613_v19  ;;  %v1615_v62 = vpop.f32.mrf.mxu2  ;;  %v1931_v19 = vld [vmem:[#allocation14_spill] sm:$0xff] }
  0xde   :  { %369 = vst [vmem:[%s1881_s5] sm:$0xff] %v1554_v0  ;;  %390 = vmatmul.f32.vlgmr.msrb.gmra.mxu1 %v1554_v0  ;;  %410 = vmatmul.f32.vlgmr.msrb.gmra.mxu2 %v1554_v0 }
  0xdf   :  { %430 = vmatmul.f32.vlgmr.msra.gmra.mxu3 %v1554_v0  ;;  %582 = vmatpush.msrb.mxu1 %v1170_v7  ;;  %1922 = vst [vmem:[#allocation25_spill] sm:$0xff] %v1615_v62 }
  0xe0   :  { %626 = vmatpush.msrb.mxu2 %v1150_v1  ;;  %646 = vmatpush.msra.mxu3 %v1279_v37 }
  0xe1   :  { %583 = vmatpush.msrb.mxu1 %v1174_v8 }
  0xe2   :  { %627 = vmatpush.msrb.mxu2 %v1156_v3  ;;  %647 = vmatpush.msra.mxu3 %v1299_v42 }
  0xe3   :  { %584 = vmatpush.msrb.mxu1 %v1178_v10 }
  0xe4   :  { %628 = vmatpush.msrb.mxu2 %v1163_v5  ;;  %648 = vmatpush.msra.mxu3 %v1308_v44  ;;  %v1617_v63 = vpop.f32.mrf.mxu1 }
  0xe5   :  { %585 = vmatpush.msrb.mxu1 %v1184_v12  ;;  %1923 = vst [vmem:[#allocation26_spill] sm:$0xff] %v1617_v63  ;;  %v1619_v40 = vpop.f32.mrf.mxu2 }
  0xe6   :  { %629 = vmatpush.msrb.mxu2 %v1168_v6  ;;  %649 = vmatpush.msra.mxu3 %v1321_v48  ;;  %1924 = vst [vmem:[#allocation27_spill] sm:$0xff] %v1619_v40 }
  0xe7   :  { %586 = vmatpush.msrb.mxu1 %v1195_v15 }
  0xe8   :  { %630 = vmatpush.msrb.mxu2 %v1176_v9  ;;  %650 = vmatpush.msra.mxu3 %v1330_v49 }
  0xe9   :  { %587 = vmatpush.msrb.mxu1 %v1208_v18 }
  0xea   :  { %631 = vmatpush.msrb.mxu2 %v1182_v11  ;;  %651 = vmatpush.msra.mxu3 %v1336_v50 }
  0xeb   :  { %588 = vmatpush.msrb.mxu1 %v1219_v21 }
  0xec   :  { %632 = vmatpush.msrb.mxu2 %v1193_v14  ;;  %652 = vmatpush.msra.mxu3 %v1351_v52  ;;  %v1621_v46 = vpop.f32.mrf.mxu1 }
  0xed   :  { %589 = vmatpush.msrb.mxu1 %v1228_v24  ;;  %1925 = vst [vmem:[#allocation28_spill] sm:$0xff] %v1621_v46  ;;  %v1623_v56 = vpop.f32.mrf.mxu2 }
  0xee   :  { %633 = vmatpush.msrb.mxu2 %v1206_v17  ;;  %653 = vmatpush.msra.mxu3 %v1360_v53  ;;  %1926 = vst [vmem:[#allocation29_spill] sm:$0xff] %v1623_v56 }
  0xef   :  { %590 = vmatpush.msrb.mxu1 %v1239_v27 }
  0xf0   :  { %634 = vmatpush.msrb.mxu2 %v1217_v20  ;;  %654 = vmatpush.msra.mxu3 %v1366_v54 }
  0xf1   :  { %591 = vmatpush.msrb.mxu1 %v1249_v29 }
  0xf2   :  { %635 = vmatpush.msrb.mxu2 %v1226_v23  ;;  %655 = vmatpush.msra.mxu3 %v1372_v55 }
  0xf3   :  { %592 = vmatpush.msrb.mxu1 %v1260_v32 }
  0xf4   :  { %636 = vmatpush.msrb.mxu2 %v1237_v26  ;;  %656 = vmatpush.msra.mxu3 %v1382_v57  ;;  %v1625_v4 = vpop.f32.mrf.mxu1 }
  0xf5   :  { %593 = vmatpush.msrb.mxu1 %v1270_v35  ;;  %1927 = vst [vmem:[#allocation30_spill] sm:$0xff] %v1625_v4  ;;  %v1627_v30 = vpop.f32.mrf.mxu2 }
  0xf6   :  { %637 = vmatpush.msrb.mxu2 %v1247_v28  ;;  %657 = vmatpush.msra.mxu3 %v1389_v58  ;;  %1928 = vst [vmem:[#allocation31_spill] sm:$0xff] %v1627_v30 }
  0xf7   :  { %594 = vmatpush.msrb.mxu1 %v1284_v39 }
  0xf8   :  { %638 = vmatpush.msrb.mxu2 %v1258_v31  ;;  %658 = vmatpush.msra.mxu3 %v1395_v59 }
  0xf9   :  { %595 = vmatpush.msrb.mxu1 %v1294_v41 }
  0xfa   :  { %639 = vmatpush.msrb.mxu2 %v1268_v34  ;;  %659 = vmatpush.msra.mxu3 %v1401_v60 }
  0xfb   :  { %596 = vmatpush.msrb.mxu1 %v1302_v43 }
  0xfc   :  { %640 = vmatpush.msrb.mxu2 %v1915_v38  ;;  %660 = vmatpush.msra.mxu3 %v1916_v61  ;;  %v1629_v22 = vpop.f32.mrf.mxu1 }
  0xfd   :  { %597 = vmatpush.msrb.mxu1 %v1917_v13  ;;  %1929 = vst [vmem:[#allocation32_spill] sm:$0xff] %v1629_v22  ;;  %v1631_v47 = vpop.f32.mrf.mxu2  ;;  %v240_v22 = vadd.f32 %v239_v45, %v1551_v2  ;;  %v1938_v45 = vld [vmem:[#allocation8_spill] sm:$0xff] }
  0xfe   :  { %641 = vmatpush.msrb.mxu2 %v1918_v25  ;;  %661 = vmatpush.msra.mxu3 %v1919_v33  ;;  %1930 = vst [vmem:[#allocation33_spill] sm:$0xff] %v1631_v47  ;;  %v1932_v25 = vld [vmem:[#allocation22_spill] sm:$0xff] }
  0xff   :  { %v199_v63 = vadd.f32 %v198_v51, %v1932_v25 }
 0x15b   :  { %v391_v16 = vpop.f32.mrf.mxu1 }
 0x15c   :  { %v434_v33 = vadd.f32 %v391_v16, %v1931_v19 }
 0x15e   :  { %v435_v62 = vmul.f32 0.5, %v434_v33 }
 0x160   :  { %1010 = vtanh.f32 %v435_v62 }
 0x161   :  { %v411_v40 = vpop.f32.mrf.mxu2 }
 0x162   :  { %v439_v13 = vadd.f32 %v411_v40, %v199_v63  ;;  %v431_v56 = vpop.f32.mrf.mxu3  ;;  %v1939_v40 = vld [vmem:[#allocation13_spill] sm:$0xff] }
 0x163   :  { %v444_v30 = vadd.f32 %v1547_v36, %v431_v56 }
 0x164   :  { %v440_v46 = vmul.f32 0.5, %v439_v13 }
 0x166   :  { %v1011_v61 = vpop.eup %1010  ;;  %1012 = vtanh.f32 %v440_v46  ;;  %v1940_v46 = vld [vmem:[#allocation24_spill] sm:$0xff] }
 0x167   :  { %v437_v4 = vmul.f32 0.5, %v1011_v61  ;;  %v1937_v61 = vld [vmem:[#allocation10_spill] sm:$0xff]  ;;  %v202_v56 = vadd.f32 %v1940_v46, %v1932_v25 }
 0x169   :  { %v438_v38 = vadd.f32 0.5, %v437_v4 }
 0x16b   :  { %v445_v47 = vmul.f32 %v444_v30, %v438_v38  ;;  %v1936_v38 = vld [vmem:[#allocation12_spill] sm:$0xff] }
 0x16c   :  { %v1013_v43 = vpop.eup %1012 }
 0x16d   :  { %v442_v60 = vmul.f32 0.5, %v1013_v43  ;;  %v446_v16 = vadd.f32 %v445_v47, %v240_v22  ;;  %v1933_v43 = vld [vmem:[#allocation11_spill] sm:$0xff]  ;;  %v1941_v22 = vld [vmem:[#allocation16_spill] sm:$0xff] }
 0x16f   :  { %1014 = vtanh.f32 %v446_v16  ;;  %v443_v33 = vadd.f32 0.5, %v442_v60  ;;  %v1934_v60 = vld [vmem:[#allocation9_spill] sm:$0xff] }
 0x171   :  { %v448_v51 = vsub.f32 1.0, %v443_v33  ;;  %v450_v62 = vmul.f32 %v443_v33, %v1554_v0  ;;  %v1935_v0 = vld [vmem:[#allocation7_spill] sm:$0xff] }
 0x175   :  { %v1015_v19 = vpop.eup %1014 }
 0x176   :  { %v449_v13 = vmul.f32 %v1015_v19, %v448_v51 }
 0x178   :  { %v1638_v63 = vadd.f32 %v450_v62, %v449_v13 }
 0x17a   :  { %988 = vst [vmem:[%s1881_s5 + $0x8] sm:$0xff] %v1638_v63  ;;  %474 = vmatmul.f32.vlgmr.msra.gmra.mxu0 %v1638_v63  ;;  %494 = vmatmul.f32.vlgmr.msra.gmra.mxu1 %v1638_v63 }
 0x17b   :  { %514 = vmatmul.f32.vlgmr.msra.gmra.mxu2 %v1638_v63  ;;  %666 = vmatpush.msra.mxu0 %v1170_v7 }
 0x17c   :  { %710 = vmatpush.msra.mxu1 %v1150_v1  ;;  %730 = vmatpush.msra.mxu2 %v1279_v37 }
 0x17d   :  { %667 = vmatpush.msra.mxu0 %v1174_v8 }
 0x17e   :  { %711 = vmatpush.msra.mxu1 %v1156_v3  ;;  %731 = vmatpush.msra.mxu2 %v1299_v42 }
 0x17f   :  { %668 = vmatpush.msra.mxu0 %v1178_v10 }
 0x180   :  { %712 = vmatpush.msra.mxu1 %v1163_v5  ;;  %732 = vmatpush.msra.mxu2 %v1308_v44 }
 0x181   :  { %669 = vmatpush.msra.mxu0 %v1184_v12 }
 0x182   :  { %713 = vmatpush.msra.mxu1 %v1168_v6  ;;  %733 = vmatpush.msra.mxu2 %v1321_v48 }
 0x183   :  { %670 = vmatpush.msra.mxu0 %v1195_v15 }
 0x184   :  { %714 = vmatpush.msra.mxu1 %v1176_v9  ;;  %734 = vmatpush.msra.mxu2 %v1330_v49 }
 0x185   :  { %671 = vmatpush.msra.mxu0 %v1208_v18 }
 0x186   :  { %715 = vmatpush.msra.mxu1 %v1182_v11  ;;  %735 = vmatpush.msra.mxu2 %v1336_v50 }
 0x187   :  { %672 = vmatpush.msra.mxu0 %v1219_v21 }
 0x188   :  { %716 = vmatpush.msra.mxu1 %v1193_v14  ;;  %736 = vmatpush.msra.mxu2 %v1351_v52 }
 0x189   :  { %673 = vmatpush.msra.mxu0 %v1228_v24 }
 0x18a   :  { %717 = vmatpush.msra.mxu1 %v1206_v17  ;;  %737 = vmatpush.msra.mxu2 %v1360_v53 }
 0x18b   :  { %674 = vmatpush.msra.mxu0 %v1239_v27 }
 0x18c   :  { %718 = vmatpush.msra.mxu1 %v1217_v20  ;;  %738 = vmatpush.msra.mxu2 %v1366_v54 }
 0x18d   :  { %675 = vmatpush.msra.mxu0 %v1249_v29 }
 0x18e   :  { %719 = vmatpush.msra.mxu1 %v1226_v23  ;;  %739 = vmatpush.msra.mxu2 %v1372_v55 }
 0x18f   :  { %676 = vmatpush.msra.mxu0 %v1260_v32 }
 0x190   :  { %720 = vmatpush.msra.mxu1 %v1237_v26  ;;  %740 = vmatpush.msra.mxu2 %v1382_v57 }
 0x191   :  { %677 = vmatpush.msra.mxu0 %v1270_v35 }
 0x192   :  { %721 = vmatpush.msra.mxu1 %v1247_v28  ;;  %741 = vmatpush.msra.mxu2 %v1389_v58 }
 0x193   :  { %678 = vmatpush.msra.mxu0 %v1284_v39 }
 0x194   :  { %722 = vmatpush.msra.mxu1 %v1258_v31  ;;  %742 = vmatpush.msra.mxu2 %v1395_v59 }
 0x195   :  { %679 = vmatpush.msra.mxu0 %v1294_v41 }
 0x196   :  { %723 = vmatpush.msra.mxu1 %v1268_v34  ;;  %743 = vmatpush.msra.mxu2 %v1933_v43 }
 0x197   :  { %680 = vmatpush.msra.mxu0 %v1934_v60 }
 0x198   :  { %724 = vmatpush.msra.mxu1 %v1935_v0  ;;  %744 = vmatpush.msra.mxu2 %v1936_v38 }
 0x199   :  { %681 = vmatpush.msra.mxu0 %v1937_v61 }
 0x19a   :  { %725 = vmatpush.msra.mxu1 %v1938_v45  ;;  %745 = vmatpush.msra.mxu2 %v1939_v40  ;;  %v1942_v40 = vld [vmem:[#allocation23_spill] sm:$0xff] }
 0x19b   :  { %v243_v0 = vadd.f32 %v1942_v40, %v1551_v2  ;;  %v1779_v40 = vld [vmem:[#allocation4 + $0x160] sm:$0xff] }
 0x1f7   :  { %v475_v4 = vpop.f32.mrf.mxu0  ;;  %v495_v30 = vpop.f32.mrf.mxu1 }
 0x1f8   :  { %v518_v47 = vadd.f32 %v475_v4, %v1941_v22  ;;  %v523_v16 = vadd.f32 %v495_v30, %v202_v56 }
 0x1fa   :  { %v519_v33 = vmul.f32 0.5, %v518_v47  ;;  %v524_v51 = vmul.f32 0.5, %v523_v16 }
 0x1fc   :  { %1016 = vtanh.f32 %v519_v33  ;;  %v1055_v33 = vld [vmem:[#allocation4 + $0x150] sm:$0xff] }
 0x1fd   :  { %1018 = vtanh.f32 %v524_v51  ;;  %v1783_v51 = vld [vmem:[#allocation4 + $0x148] sm:$0xff] }
 0x1fe   :  { %v515_v62 = vpop.f32.mrf.mxu2 }
 0x1ff   :  { %v528_v45 = vadd.f32 %v1547_v36, %v515_v62  ;;  %v1787_v62 = vld [vmem:[#allocation4 + $0x130] sm:$0xff] }
 0x202   :  { %v1017_v19 = vpop.eup %1016 }
 0x203   :  { %v521_v13 = vmul.f32 0.5, %v1017_v19  ;;  %v1019_v61 = vpop.eup %1018  ;;  %v1057_v19 = vld [vmem:[#allocation4 + $0x138] sm:$0xff] }
 0x204   :  { %v526_v25 = vmul.f32 0.5, %v1019_v61  ;;  %v1775_v61 = vld [vmem:[#allocation4 + $0x178] sm:$0xff] }
 0x205   :  { %v522_v38 = vadd.f32 0.5, %v521_v13  ;;  %v1791_v13 = vld [vmem:[#allocation4 + $0x118] sm:$0xff] }
 0x206   :  { %v527_v4 = vadd.f32 0.5, %v526_v25 }
 0x207   :  { %v529_v46 = vmul.f32 %v528_v45, %v522_v38  ;;  %v1053_v45 = vld [vmem:[#allocation4 + $0x168] sm:$0xff] }
 0x208   :  { %v532_v56 = vsub.f32 1.0, %v527_v4  ;;  %v534_v22 = vmul.f32 %v527_v4, %v1638_v63  ;;  %v1799_v4 = vld [vmem:[#allocation4 + $0xe8] sm:$0xff] }
 0x209   :  { %v530_v60 = vadd.f32 %v529_v46, %v243_v0  ;;  %v1795_v46 = vld [vmem:[#allocation4 + $0x100] sm:$0xff] }
 0x20b   :  { %1020 = vtanh.f32 %v530_v60 }
 0x211   :  { %v1021_v30 = vpop.eup %1020 }
 0x212   :  { %v533_v47 = vmul.f32 %v1021_v30, %v532_v56  ;;  %v1803_v56 = vld [vmem:[#allocation4 + $0xd0] sm:$0xff]  ;;  %v1807_v30 = vld [vmem:[#allocation4 + $0xb8] sm:$0xff] }
 0x214   :  { %v1702_v16 = vadd.f32 %v534_v22, %v533_v47  ;;  %v1811_v22 = vld [vmem:[#allocation4 + $0xa0] sm:$0xff]  ;;  %v1815_v47 = vld [vmem:[#allocation4 + $0x88] sm:$0xff] }
 0x216   :  { %989 = vst [vmem:[%s1881_s5 + $0x10] sm:$0xff] %v1702_v16  ;;  %558 = vmatmul.f32.vlgmr.msrb.gmra.mxu3 %v1702_v16  ;;  %578 = vmatmul.f32.vlgmr.msrb.gmra.mxu0 %v1702_v16 }
 0x217   :  { %598 = vmatmul.f32.vlgmr.msrb.gmra.mxu1 %v1702_v16  ;;  %750 = vmatpush.msrb.mxu3 %v1170_v7  ;;  %v1947_v7 = vld [vmem:[#allocation8_spill] sm:$0xff] }
 0x218   :  { %794 = vmatpush.msrb.mxu0 %v1150_v1  ;;  %814 = vmatpush.msrb.mxu1 %v1279_v37  ;;  %v1943_v1 = vld [vmem:[#allocation9_spill] sm:$0xff] }
 0x219   :  { %751 = vmatpush.msrb.mxu3 %v1174_v8  ;;  %v1948_v8 = vld [vmem:[#allocation13_spill] sm:$0xff] }
 0x21a   :  { %795 = vmatpush.msrb.mxu0 %v1156_v3  ;;  %815 = vmatpush.msrb.mxu1 %v1299_v42  ;;  %v1944_v3 = vld [vmem:[#allocation7_spill] sm:$0xff] }
 0x21b   :  { %752 = vmatpush.msrb.mxu3 %v1178_v10  ;;  %v1949_v10 = vld [vmem:[#allocation22_spill] sm:$0xff] }
 0x21c   :  { %796 = vmatpush.msrb.mxu0 %v1163_v5  ;;  %816 = vmatpush.msrb.mxu1 %v1308_v44  ;;  %v1945_v5 = vld [vmem:[#allocation12_spill] sm:$0xff] }
 0x21d   :  { %753 = vmatpush.msrb.mxu3 %v1184_v12 }
 0x21e   :  { %797 = vmatpush.msrb.mxu0 %v1168_v6  ;;  %817 = vmatpush.msrb.mxu1 %v1321_v48  ;;  %v1946_v6 = vld [vmem:[#allocation10_spill] sm:$0xff] }
 0x21f   :  { %754 = vmatpush.msrb.mxu3 %v1195_v15 }
 0x220   :  { %798 = vmatpush.msrb.mxu0 %v1176_v9  ;;  %818 = vmatpush.msrb.mxu1 %v1330_v49 }
 0x221   :  { %755 = vmatpush.msrb.mxu3 %v1208_v18 }
 0x222   :  { %799 = vmatpush.msrb.mxu0 %v1182_v11  ;;  %819 = vmatpush.msrb.mxu1 %v1336_v50  ;;  %v1950_v11 = vld [vmem:[#allocation26_spill] sm:$0xff] }
 0x223   :  { %756 = vmatpush.msrb.mxu3 %v1219_v21  ;;  %v205_v12 = vadd.f32 %v1950_v11, %v1949_v10 }
 0x224   :  { %800 = vmatpush.msrb.mxu0 %v1193_v14  ;;  %820 = vmatpush.msrb.mxu1 %v1351_v52 }
 0x225   :  { %757 = vmatpush.msrb.mxu3 %v1228_v24 }
 0x226   :  { %801 = vmatpush.msrb.mxu0 %v1206_v17  ;;  %821 = vmatpush.msrb.mxu1 %v1360_v53  ;;  %v1951_v17 = vld [vmem:[#allocation17_spill] sm:$0xff] }
 0x227   :  { %758 = vmatpush.msrb.mxu3 %v1239_v27 }
 0x228   :  { %802 = vmatpush.msrb.mxu0 %v1217_v20  ;;  %822 = vmatpush.msrb.mxu1 %v1366_v54 }
 0x229   :  { %759 = vmatpush.msrb.mxu3 %v1249_v29 }
 0x22a   :  { %803 = vmatpush.msrb.mxu0 %v1226_v23  ;;  %823 = vmatpush.msrb.mxu1 %v1372_v55 }
 0x22b   :  { %760 = vmatpush.msrb.mxu3 %v1260_v32 }
 0x22c   :  { %804 = vmatpush.msrb.mxu0 %v1237_v26  ;;  %824 = vmatpush.msrb.mxu1 %v1382_v57 }
 0x22d   :  { %761 = vmatpush.msrb.mxu3 %v1270_v35 }
 0x22e   :  { %805 = vmatpush.msrb.mxu0 %v1247_v28  ;;  %825 = vmatpush.msrb.mxu1 %v1389_v58 }
 0x22f   :  { %762 = vmatpush.msrb.mxu3 %v1284_v39 }
 0x230   :  { %806 = vmatpush.msrb.mxu0 %v1258_v31  ;;  %826 = vmatpush.msrb.mxu1 %v1395_v59  ;;  %v1952_v31 = vld [vmem:[#allocation25_spill] sm:$0xff] }
 0x231   :  { %763 = vmatpush.msrb.mxu3 %v1294_v41  ;;  %v246_v32 = vadd.f32 %v1952_v31, %v1551_v2 }
 0x232   :  { %807 = vmatpush.msrb.mxu0 %v1268_v34  ;;  %827 = vmatpush.msrb.mxu1 %v1933_v43 }
 0x233   :  { %764 = vmatpush.msrb.mxu3 %v1943_v1  ;;  %v1076_v1 = vld [vmem:[#allocation4 + $0x58] sm:$0xff] }
 0x234   :  { %808 = vmatpush.msrb.mxu0 %v1944_v3  ;;  %828 = vmatpush.msrb.mxu1 %v1945_v5  ;;  %v1077_v3 = vld [vmem:[#allocation4 + $0x48] sm:$0xff] }
 0x235   :  { %765 = vmatpush.msrb.mxu3 %v1946_v6  ;;  %v1079_v6 = vld [vmem:[#allocation4 + $0x30] sm:$0xff] }
 0x236   :  { %809 = vmatpush.msrb.mxu0 %v1947_v7  ;;  %829 = vmatpush.msrb.mxu1 %v1948_v8  ;;  %v1081_v7 = vld [vmem:[#allocation4 + $0x18] sm:$0xff] }
 0x293   :  { %v579_v9 = vpop.f32.mrf.mxu0 }
 0x294   :  { %v607_v14 = vadd.f32 %v579_v9, %v205_v12  ;;  %v599_v24 = vpop.f32.mrf.mxu1  ;;  %v1082_v9 = vld [vmem:[#allocation4 + $0x10] sm:$0xff] }
 0x295   :  { %v612_v28 = vadd.f32 %v1547_v36, %v599_v24 }
 0x296   :  { %v608_v21 = vmul.f32 0.5, %v607_v14 }
 0x299   :  { %v559_v15 = vpop.f32.mrf.mxu3 }
 0x29a   :  { %v602_v18 = vadd.f32 %v559_v15, %v1951_v17  ;;  %v1954_v15 = vld [vmem:[#allocation18_spill] sm:$0xff] }
 0x29c   :  { %v603_v20 = vmul.f32 0.5, %v602_v18 }
 0x29e   :  { %1022 = vtanh.f32 %v603_v20 }
 0x29f   :  { %1024 = vtanh.f32 %v608_v21 }
 0x2a4   :  { %v1023_v23 = vpop.eup %1022 }
 0x2a5   :  { %v605_v26 = vmul.f32 0.5, %v1023_v23  ;;  %v1025_v27 = vpop.eup %1024 }
 0x2a6   :  { %v610_v35 = vmul.f32 0.5, %v1025_v27 }
 0x2a7   :  { %v606_v29 = vadd.f32 0.5, %v605_v26 }
 0x2a8   :  { %v611_v41 = vadd.f32 0.5, %v610_v35 }
 0x2a9   :  { %v613_v34 = vmul.f32 %v612_v28, %v606_v29 }
 0x2aa   :  { %v616_v25 = vsub.f32 1.0, %v611_v41  ;;  %v618_v60 = vmul.f32 %v611_v41, %v1702_v16  ;;  %v1819_v16 = vld [vmem:[#allocation4 + $0x70] sm:$0xff] }
 0x2ab   :  { %v614_v39 = vadd.f32 %v613_v34, %v246_v32 }
 0x2ad   :  { %1026 = vtanh.f32 %v614_v39 }
 0x2b3   :  { %v1027_v63 = vpop.eup %1026 }
 0x2b4   :  { %v617_v0 = vmul.f32 %v1027_v63, %v616_v25 }
 0x2b6   :  { %v1766_v38 = vadd.f32 %v618_v60, %v617_v0  ;;  %v1956_v0 = vld [vmem:[#allocation19_spill] sm:$0xff] }
 0x2b8   :  { %990 = vst [vmem:[%s1881_s5 + $0x18] sm:$0xff] %v1766_v38  ;;  %642 = vmatmul.f32.vlgmr.msrb.gmra.mxu2 %v1766_v38  ;;  %662 = vmatmul.f32.vlgmr.msra.gmra.mxu3 %v1766_v38 }
 0x2b9   :  { %682 = vmatmul.f32.vlgmr.msra.gmra.mxu0 %v1766_v38  ;;  %834 = vmatpush.msrb.mxu2 %v1775_v61 }
 0x2ba   :  { %878 = vmatpush.msra.mxu3 %v1053_v45  ;;  %898 = vmatpush.msra.mxu0 %v1279_v37  ;;  %v1059_v37 = vld [vmem:[#allocation4 + $0x120] sm:$0xff]  ;;  %v1957_v45 = vld [vmem:[#allocation30_spill] sm:$0xff] }
 0x2bb   :  { %835 = vmatpush.msrb.mxu2 %v1779_v40 }
 0x2bc   :  { %879 = vmatpush.msra.mxu3 %v1055_v33  ;;  %899 = vmatpush.msra.mxu0 %v1299_v42  ;;  %v1061_v42 = vld [vmem:[#allocation4 + $0x108] sm:$0xff] }
 0x2bd   :  { %836 = vmatpush.msrb.mxu2 %v1783_v51 }
 0x2be   :  { %880 = vmatpush.msra.mxu3 %v1057_v19  ;;  %900 = vmatpush.msra.mxu0 %v1308_v44  ;;  %v1063_v44 = vld [vmem:[#allocation4 + $0xf0] sm:$0xff] }
 0x2bf   :  { %837 = vmatpush.msrb.mxu2 %v1787_v62 }
 0x2c0   :  { %881 = vmatpush.msra.mxu3 %v1059_v37  ;;  %901 = vmatpush.msra.mxu0 %v1321_v48  ;;  %v1065_v48 = vld [vmem:[#allocation4 + $0xd8] sm:$0xff] }
 0x2c1   :  { %838 = vmatpush.msrb.mxu2 %v1791_v13 }
 0x2c2   :  { %882 = vmatpush.msra.mxu3 %v1061_v42  ;;  %902 = vmatpush.msra.mxu0 %v1330_v49  ;;  %v1067_v49 = vld [vmem:[#allocation4 + $0xc0] sm:$0xff] }
 0x2c3   :  { %839 = vmatpush.msrb.mxu2 %v1795_v46 }
 0x2c4   :  { %883 = vmatpush.msra.mxu3 %v1063_v44  ;;  %903 = vmatpush.msra.mxu0 %v1336_v50  ;;  %v1069_v50 = vld [vmem:[#allocation4 + $0xa8] sm:$0xff]  ;;  %v1958_v44 = vld [vmem:[#allocation29_spill] sm:$0xff] }
 0x2c5   :  { %840 = vmatpush.msrb.mxu2 %v1799_v4 }
 0x2c6   :  { %884 = vmatpush.msra.mxu3 %v1065_v48  ;;  %904 = vmatpush.msra.mxu0 %v1351_v52  ;;  %v1071_v52 = vld [vmem:[#allocation4 + $0x90] sm:$0xff] }
 0x2c7   :  { %841 = vmatpush.msrb.mxu2 %v1803_v56 }
 0x2c8   :  { %885 = vmatpush.msra.mxu3 %v1067_v49  ;;  %905 = vmatpush.msra.mxu0 %v1360_v53  ;;  %v1073_v53 = vld [vmem:[#allocation4 + $0x78] sm:$0xff] }
 0x2c9   :  { %842 = vmatpush.msrb.mxu2 %v1807_v30 }
 0x2ca   :  { %886 = vmatpush.msra.mxu3 %v1069_v50  ;;  %906 = vmatpush.msra.mxu0 %v1366_v54  ;;  %v1075_v54 = vld [vmem:[#allocation4 + $0x60] sm:$0xff] }
 0x2cb   :  { %843 = vmatpush.msrb.mxu2 %v1811_v22 }
 0x2cc   :  { %887 = vmatpush.msra.mxu3 %v1071_v52  ;;  %907 = vmatpush.msra.mxu0 %v1372_v55  ;;  %v1078_v55 = vld [vmem:[#allocation4 + $0x40] sm:$0xff] }
 0x2cd   :  { %844 = vmatpush.msrb.mxu2 %v1815_v47 }
 0x2ce   :  { %888 = vmatpush.msra.mxu3 %v1073_v53  ;;  %908 = vmatpush.msra.mxu0 %v1382_v57  ;;  %v1080_v57 = vld [vmem:[#allocation4 + $0x28] sm:$0xff] }
 0x2cf   :  { %845 = vmatpush.msrb.mxu2 %v1819_v16 }
 0x2d0   :  { %889 = vmatpush.msra.mxu3 %v1075_v54  ;;  %909 = vmatpush.msra.mxu0 %v1389_v58  ;;  %v1083_v58 = vld [vmem:[#allocation4] sm:$0xff]  ;;  %v1959_v54 = vld [vmem:[#allocation32_spill] sm:$0xff] }
 0x2d1   :  { %846 = vmatpush.msrb.mxu2 %v1076_v1 }
 0x2d2   :  { %890 = vmatpush.msra.mxu3 %v1077_v3  ;;  %910 = vmatpush.msra.mxu0 %v1395_v59  ;;  %v1953_v59 = vld [vmem:[#allocation28_spill] sm:$0xff] }
 0x2d3   :  { %847 = vmatpush.msrb.mxu2 %v1078_v55  ;;  %v208_v11 = vadd.f32 %v1953_v59, %v1949_v10 }
 0x2d4   :  { %891 = vmatpush.msra.mxu3 %v1079_v6  ;;  %911 = vmatpush.msra.mxu0 %v1933_v43  ;;  %v1960_v6 = vld [vmem:[#allocation20_spill] sm:$0xff] }
 0x2d5   :  { %848 = vmatpush.msrb.mxu2 %v1080_v57 }
 0x2d6   :  { %892 = vmatpush.msra.mxu3 %v1081_v7  ;;  %912 = vmatpush.msra.mxu0 %v1945_v5 }
 0x2d7   :  { %849 = vmatpush.msrb.mxu2 %v1082_v9 }
 0x2d8   :  { %893 = vmatpush.msra.mxu3 %v1083_v58  ;;  %913 = vmatpush.msra.mxu0 %v1948_v8  ;;  %v1955_v8 = vld [vmem:[#allocation27_spill] sm:$0xff] }
 0x2d9   :  { %v249_v28 = vadd.f32 %v1955_v8, %v1551_v2 }
 0x336   :  { %v683_v5 = vpop.f32.mrf.mxu0 }
 0x337   :  { %v696_v26 = vadd.f32 %v1547_v36, %v683_v5 }
 0x33b   :  { %v643_v12 = vpop.f32.mrf.mxu2  ;;  %v663_v14 = vpop.f32.mrf.mxu3 }
 0x33c   :  { %v686_v17 = vadd.f32 %v643_v12, %v1954_v15  ;;  %v691_v43 = vadd.f32 %v663_v14, %v208_v11 }
 0x33e   :  { %v687_v18 = vmul.f32 0.5, %v686_v17  ;;  %v692_v20 = vmul.f32 0.5, %v691_v43  ;;  %v1961_v43 = vld [vmem:[#allocation31_spill] sm:$0xff] }
 0x340   :  { %1028 = vtanh.f32 %v687_v18  ;;  %v255_v18 = vadd.f32 %v1961_v43, %v1551_v2 }
 0x341   :  { %1030 = vtanh.f32 %v692_v20 }
 0x346   :  { %v1029_v21 = vpop.eup %1028 }
 0x347   :  { %v689_v23 = vmul.f32 0.5, %v1029_v21  ;;  %v1031_v24 = vpop.eup %1030 }
 0x348   :  { %v694_v31 = vmul.f32 0.5, %v1031_v24 }
 0x349   :  { %v690_v27 = vadd.f32 0.5, %v689_v23 }
 0x34a   :  { %v695_v34 = vadd.f32 0.5, %v694_v31  ;;  %v1962_v31 = vld [vmem:[#allocation21_spill] sm:$0xff] }
 0x34b   :  { %v697_v29 = vmul.f32 %v696_v26, %v690_v27 }
 0x34c   :  { %v700_v35 = vsub.f32 1.0, %v695_v34  ;;  %v702_v25 = vmul.f32 %v695_v34, %v1766_v38 }
 0x34d   :  { %v698_v32 = vadd.f32 %v697_v29, %v249_v28 }
 0x34f   :  { %1032 = vtanh.f32 %v698_v32  ;;  %v217_v32 = vadd.f32 %v1962_v31, %v1949_v10 }
 0x355   :  { %v1033_v39 = vpop.eup %1032 }
 0x356   :  { %v701_v41 = vmul.f32 %v1033_v39, %v700_v35  ;;  %v1963_v39 = vld [vmem:[#allocation15_spill] sm:$0xff] }
 0x358   :  { %v703_v63 = vadd.f32 %v702_v25, %v701_v41 }
 0x35a   :  { %991 = vst [vmem:[%s1881_s5 + $0x20] sm:$0xff] %v703_v63  ;;  %726 = vmatmul.f32.vlgmr.msra.gmra.mxu1 %v703_v63  ;;  %746 = vmatmul.f32.vlgmr.msra.gmra.mxu2 %v703_v63 }
 0x35b   :  { %766 = vmatmul.f32.vlgmr.msrb.gmra.mxu3 %v703_v63  ;;  %918 = vmatpush.msra.mxu1 %v1775_v61 }
 0x35d   :  { %919 = vmatpush.msra.mxu1 %v1779_v40  ;;  %v211_v40 = vadd.f32 %v1957_v45, %v1949_v10 }
 0x35f   :  { %920 = vmatpush.msra.mxu1 %v1783_v51 }
 0x361   :  { %921 = vmatpush.msra.mxu1 %v1787_v62 }
 0x363   :  { %922 = vmatpush.msra.mxu1 %v1791_v13 }
 0x365   :  { %923 = vmatpush.msra.mxu1 %v1795_v46 }
 0x367   :  { %924 = vmatpush.msra.mxu1 %v1799_v4  ;;  %v252_v4 = vadd.f32 %v1958_v44, %v1551_v2 }
 0x369   :  { %925 = vmatpush.msra.mxu1 %v1803_v56 }
 0x36b   :  { %926 = vmatpush.msra.mxu1 %v1807_v30 }
 0x36d   :  { %927 = vmatpush.msra.mxu1 %v1811_v22 }
 0x36f   :  { %928 = vmatpush.msra.mxu1 %v1815_v47 }
 0x371   :  { %929 = vmatpush.msra.mxu1 %v1819_v16 }
 0x373   :  { %930 = vmatpush.msra.mxu1 %v1076_v1  ;;  %v214_v1 = vadd.f32 %v1959_v54, %v1949_v10 }
 0x375   :  { %931 = vmatpush.msra.mxu1 %v1078_v55 }
 0x377   :  { %932 = vmatpush.msra.mxu1 %v1080_v57 }
 0x379   :  { %933 = vmatpush.msra.mxu1 %v1082_v9 }
 0x3d7   :  { %v727_v60 = vpop.f32.mrf.mxu1 }
 0x3d8   :  { %v770_v38 = vadd.f32 %v727_v60, %v1956_v0 }
 0x3da   :  { %v771_v61 = vmul.f32 0.5, %v770_v38 }
 0x3dc   :  { %1034 = vtanh.f32 %v771_v61 }
 0x3dd   :  { %v747_v33 = vpop.f32.mrf.mxu2 }
 0x3de   :  { %v775_v51 = vadd.f32 %v747_v33, %v211_v40  ;;  %v767_v37 = vpop.f32.mrf.mxu3  ;;  %v1964_v33 = vld [vmem:[#allocation33_spill] sm:$0xff] }
 0x3df   :  { %v780_v46 = vadd.f32 %v1547_v36, %v767_v37 }
 0x3e0   :  { %v776_v19 = vmul.f32 0.5, %v775_v51  ;;  %v258_v51 = vadd.f32 %v1964_v33, %v1551_v2 }
 0x3e2   :  { %v1035_v62 = vpop.eup %1034  ;;  %1036 = vtanh.f32 %v776_v19 }
 0x3e3   :  { %v773_v13 = vmul.f32 0.5, %v1035_v62 }
 0x3e5   :  { %v774_v42 = vadd.f32 0.5, %v773_v13 }
 0x3e7   :  { %v781_v48 = vmul.f32 %v780_v46, %v774_v42 }
 0x3e8   :  { %v1037_v56 = vpop.eup %1036 }
 0x3e9   :  { %v778_v49 = vmul.f32 0.5, %v1037_v56  ;;  %v782_v30 = vadd.f32 %v781_v48, %v252_v4 }
 0x3eb   :  { %1038 = vtanh.f32 %v782_v30  ;;  %v779_v50 = vadd.f32 0.5, %v778_v49 }
 0x3ed   :  { %v784_v22 = vsub.f32 1.0, %v779_v50  ;;  %v786_v47 = vmul.f32 %v779_v50, %v703_v63 }
 0x3f1   :  { %v1039_v52 = vpop.eup %1038 }
 0x3f2   :  { %v785_v53 = vmul.f32 %v1039_v52, %v784_v22 }
 0x3f4   :  { %v787_v16 = vadd.f32 %v786_v47, %v785_v53 }
 0x3f6   :  { %992 = vst [vmem:[%s1881_s5 + $0x28] sm:$0xff] %v787_v16  ;;  %810 = vmatmul.f32.vlgmr.msrb.gmra.mxu0 %v787_v16  ;;  %830 = vmatmul.f32.vlgmr.msrb.gmra.mxu1 %v787_v16 }
 0x3f7   :  { %850 = vmatmul.f32.vlgmr.msrb.gmra.mxu2 %v787_v16 }
 0x473   :  { %v811_v3 = vpop.f32.mrf.mxu0  ;;  %v831_v55 = vpop.f32.mrf.mxu1 }
 0x474   :  { %v854_v57 = vadd.f32 %v811_v3, %v1960_v6  ;;  %v859_v7 = vadd.f32 %v831_v55, %v214_v1 }
 0x476   :  { %v855_v9 = vmul.f32 0.5, %v854_v57  ;;  %v860_v58 = vmul.f32 0.5, %v859_v7 }
 0x478   :  { %1040 = vtanh.f32 %v855_v9 }
 0x479   :  { %1042 = vtanh.f32 %v860_v58 }
 0x47a   :  { %v851_v11 = vpop.f32.mrf.mxu2 }
 0x47b   :  { %v864_v17 = vadd.f32 %v1547_v36, %v851_v11 }
 0x47e   :  { %v1041_v59 = vpop.eup %1040 }
 0x47f   :  { %v857_v12 = vmul.f32 0.5, %v1041_v59  ;;  %v1043_v14 = vpop.eup %1042 }
 0x480   :  { %v862_v21 = vmul.f32 0.5, %v1043_v14 }
 0x481   :  { %v858_v15 = vadd.f32 0.5, %v857_v12 }
 0x482   :  { %v863_v23 = vadd.f32 0.5, %v862_v21 }
 0x483   :  { %v865_v20 = vmul.f32 %v864_v17, %v858_v15 }
 0x484   :  { %v868_v24 = vsub.f32 1.0, %v863_v23  ;;  %v870_v27 = vmul.f32 %v863_v23, %v787_v16 }
 0x485   :  { %v866_v5 = vadd.f32 %v865_v20, %v255_v18 }
 0x487   :  { %1044 = vtanh.f32 %v866_v5 }
 0x48d   :  { %v1045_v26 = vpop.eup %1044 }
 0x48e   :  { %v869_v8 = vmul.f32 %v1045_v26, %v868_v24 }
 0x490   :  { %v871_v28 = vadd.f32 %v870_v27, %v869_v8 }
 0x492   :  { %993 = vst [vmem:[%s1881_s5 + $0x30] sm:$0xff] %v871_v28  ;;  %894 = vmatmul.f32.vlgmr.msra.gmra.mxu3 %v871_v28  ;;  %914 = vmatmul.f32.vlgmr.msra.gmra.mxu0 %v871_v28 }
 0x493   :  { %934 = vmatmul.f32.vlgmr.msra.gmra.mxu1 %v871_v28 }
 0x50f   :  { %v915_v29 = vpop.f32.mrf.mxu0 }
 0x510   :  { %v943_v34 = vadd.f32 %v915_v29, %v217_v32  ;;  %v935_v0 = vpop.f32.mrf.mxu1 }
 0x511   :  { %v948_v45 = vadd.f32 %v1547_v36, %v935_v0 }
 0x512   :  { %v944_v63 = vmul.f32 0.5, %v943_v34 }
 0x515   :  { %v895_v35 = vpop.f32.mrf.mxu3 }
 0x516   :  { %v938_v41 = vadd.f32 %v895_v35, %v1963_v39 }
 0x518   :  { %v939_v25 = vmul.f32 0.5, %v938_v41 }
 0x51a   :  { %1046 = vtanh.f32 %v939_v25 }
 0x51b   :  { %1048 = vtanh.f32 %v944_v63 }
 0x520   :  { %v1047_v60 = vpop.eup %1046 }
 0x521   :  { %v941_v38 = vmul.f32 0.5, %v1047_v60  ;;  %v1049_v61 = vpop.eup %1048 }
 0x522   :  { %v946_v10 = vmul.f32 0.5, %v1049_v61 }
 0x523   :  { %v942_v40 = vadd.f32 0.5, %v941_v38 }
 0x524   :  { %v947_v37 = vadd.f32 0.5, %v946_v10 }
 0x525   :  { %v949_v19 = vmul.f32 %v948_v45, %v942_v40 }
 0x526   :  { %v952_v13 = vsub.f32 1.0, %v947_v37  ;;  %v954_v46 = vmul.f32 %v947_v37, %v871_v28 }
 0x527   :  { %v950_v62 = vadd.f32 %v949_v19, %v258_v51 }
 0x529   :  { %1050 = vtanh.f32 %v950_v62 }
 0x52f   :  { %v1051_v42 = vpop.eup %1050 }
 0x530   :  { %v953_v44 = vmul.f32 %v1051_v42, %v952_v13 }
 0x532   :  { %v955_v4 = vadd.f32 %v954_v46, %v953_v44 }
 0x534   :  { %994 = vst [vmem:[%s1881_s5 + $0x38] sm:$0xff] %v955_v4 }
 0x535   :  { %963 = vsyncpa [#allocation5], 1 }

</bundles_post_ra>
